<compile_context>
chip_gen: v5e
topology: v5e:2x2
jax: 0.10.0
libtpu: 0.0.40
codegen_flags: <defaults>
</compile_context>

<pallas_src>
import math

import jax
import jax.numpy as jnp
from jax.experimental import pallas as pl
from jax.experimental.pallas import tpu as pltpu


def _round_up(x, m):
    return (x + m - 1) // m * m


# ----------------------------------------------------------------------------
# Fused kernel: GAP + (Linear, ReLU) x2 + Linear, single grid step.
# ----------------------------------------------------------------------------
def _fused_gap_mlp_kernel(x_ref, w1_ref, b1_ref, w2_ref, b2_ref,
                          w3_ref, b3_ref, o_ref):
    # Global average pool over the (zero-padded) spatial axis.  The 1/(H*W)
    # scale is folded into w1 at parameter-prep time, so a plain lane-axis
    # sum suffices (zero spatial/channel padding contributes nothing).
    pooled = jnp.sum(x_ref[...].astype(jnp.float32), axis=-1)       # (Bp, Cp)

    # dense1 + ReLU   (dropout1: inference-mode identity, see TODO above)
    h = jnp.dot(pooled.astype(w1_ref.dtype), w1_ref[...],
                preferred_element_type=jnp.float32)
    h = jnp.maximum(h + b1_ref[...].astype(jnp.float32), 0.0)

    # dense2 + ReLU   (dropout2: inference-mode identity)
    h = jnp.dot(h.astype(w2_ref.dtype), w2_ref[...],
                preferred_element_type=jnp.float32)
    h = jnp.maximum(h + b2_ref[...].astype(jnp.float32), 0.0)

    # dense3
    out = jnp.dot(h.astype(w3_ref.dtype), w3_ref[...],
                  preferred_element_type=jnp.float32)
    out = out + b3_ref[...].astype(jnp.float32)
    o_ref[...] = out.astype(o_ref.dtype)


# ----------------------------------------------------------------------------
# One-time parameter preparation (hoisted out of the forward path).
# ----------------------------------------------------------------------------
def prepare_params(params1, params2, params3, hw, param_dtype=jnp.float32):
    """Pad weights/biases to lane-dense 128-multiples, fold the 1/(H*W) scale
    into w1, and cast weights to `param_dtype` (use jnp.bfloat16 to halve
    weight bandwidth on large hidden dims).  paramsN = (weight (K, N), bias (N,))
    with weights already in (in, out) layout."""
    (w1, b1), (w2, b2), (w3, b3) = params1, params2, params3
    C, H1 = w1.shape
    assert w2.shape[0] == H1
    H2 = w2.shape[1]
    assert w3.shape[0] == H2
    NC = w3.shape[1]

    Cp = _round_up(C, 128)
    H1p = _round_up(H1, 128)
    H2p = _round_up(H2, 128)
    NCp = _round_up(NC, 128)

    # Fold average-pool scale into w1 (bias unchanged).
    w1p = jnp.pad(w1.astype(jnp.float32) * (1.0 / hw),
                  ((0, Cp - C), (0, H1p - H1))).astype(param_dtype)
    b1p = jnp.pad(b1, ((0, H1p - H1),)).reshape(1, H1p).astype(jnp.float32)
    w2p = jnp.pad(w2, ((0, H1p - H1), (0, H2p - H2))).astype(param_dtype)
    b2p = jnp.pad(b2, ((0, H2p - H2),)).reshape(1, H2p).astype(jnp.float32)
    w3p = jnp.pad(w3, ((0, H2p - H2), (0, NCp - NC))).astype(param_dtype)
    b3p = jnp.pad(b3, ((0, NCp - NC),)).reshape(1, NCp).astype(jnp.float32)
    return (w1p, b1p, w2p, b2p, w3p, b3p)


# ----------------------------------------------------------------------------
# Forward: x (B, C, H, W) -> (B, num_classes)
# ----------------------------------------------------------------------------
def gap_mlp_block(x, prepared, num_classes):
    w1p, b1p, w2p, b2p, w3p, b3p = prepared
    B, C, H, W = x.shape
    HW = H * W

    Bp = _round_up(B, 8)              # sublane-aligned matmul M
    Cp = w1p.shape[0]                 # channel / first-K dim (128-aligned)
    H1p = w1p.shape[1]
    H2p = w2p.shape[1]
    NCp = w3p.shape[1]
    HWp = _round_up(HW, 128)          # lane-aligned spatial axis

    x3 = x.reshape(B, C, HW)
    if (Bp, Cp, HWp) != (B, C, HW):
        x3 = jnp.pad(x3, ((0, Bp - B), (0, Cp - C), (0, HWp - HW)))

    resident_bytes = sum(int(a.size) * a.dtype.itemsize
                         for a in (x3, w1p, b1p, w2p, b2p, w3p, b3p))
    assert 2 * resident_bytes < 24 * 1024 * 1024, (
        "fused working set too large for a single resident kernel; "
        "K-tile the hidden matmuls instead (see TODO at top)")

    flops = 2 * Bp * (Cp * H1p + H1p * H2p + H2p * NCp) + Bp * Cp * HWp
    bytes_accessed = resident_bytes + Bp * NCp * x.dtype.itemsize

    out = pl.pallas_call(
        _fused_gap_mlp_kernel,
        out_shape=jax.ShapeDtypeStruct((Bp, NCp), x.dtype),
        grid_spec=pltpu.PrefetchScalarGridSpec(
            num_scalar_prefetch=0,
            grid=(1,),
            in_specs=[
                pl.BlockSpec((Bp, Cp, HWp), lambda i: (0, 0, 0)),
                pl.BlockSpec(w1p.shape, lambda i: (0, 0)),
                pl.BlockSpec(b1p.shape, lambda i: (0, 0)),
                pl.BlockSpec(w2p.shape, lambda i: (0, 0)),
                pl.BlockSpec(b2p.shape, lambda i: (0, 0)),
                pl.BlockSpec(w3p.shape, lambda i: (0, 0)),
                pl.BlockSpec(b3p.shape, lambda i: (0, 0)),
            ],
            out_specs=pl.BlockSpec((Bp, NCp), lambda i: (0, 0)),
        ),
        compiler_params=pltpu.CompilerParams(
            dimension_semantics=("arbitrary",),
        ),
        cost_estimate=pl.CostEstimate(
            flops=flops, transcendentals=0, bytes_accessed=bytes_accessed),
    )(x3, w1p, b1p, w2p, b2p, w3p, b3p)

    return out[:B, :num_classes]


if __name__ == "__main__":
    # Small deterministic config consistent with the module structure:
    # in_features (=channels) = 32, hidden (stands in for 4096) = 256,
    # num_classes = 10, input (2, 32, 16, 16).
    B, C, H, W = 2, 32, 16, 16
    hidden, num_classes = 256, 10

    key = jax.random.PRNGKey(0)
    ks = jax.random.split(key, 7)

    x = jax.random.normal(ks[0], (B, C, H, W), dtype=jnp.float32)

    def linear_init(kw, kb, fan_in, fan_out):
        # PyTorch nn.Linear default init, weights stored as (in, out).
        bound = 1.0 / math.sqrt(fan_in)
        w = jax.random.uniform(kw, (fan_in, fan_out), minval=-bound,
                               maxval=bound, dtype=jnp.float32)
        bvec = jax.random.uniform(kb, (fan_out,), minval=-bound,
                                  maxval=bound, dtype=jnp.float32)
        return w, bvec

    w1, b1 = linear_init(ks[1], ks[2], C, hidden)
    w2, b2 = linear_init(ks[3], ks[4], hidden, hidden)
    w3, b3 = linear_init(ks[5], ks[6], hidden, num_classes)

    # One-time parameter prep (padding + 1/(H*W) fold), hoisted out of forward.
    prepared = prepare_params((w1, b1), (w2, b2), (w3, b3), hw=H * W)
    prepared = jax.block_until_ready(prepared)

    out = gap_mlp_block(x, prepared, num_classes)
    out = jax.block_until_ready(out)

    # In-script reference (eval-mode forward of GAPMLPBlock).
    pooled_ref = jnp.mean(x, axis=(2, 3))
    h_ref = jnp.maximum(pooled_ref @ w1 + b1, 0.0)
    h_ref = jnp.maximum(h_ref @ w2 + b2, 0.0)
    ref = h_ref @ w3 + b3

    assert out.shape == (B, num_classes)
    assert jnp.allclose(out, ref, atol=2e-3, rtol=2e-3)

    print("KERNEL_OK")
</pallas_src>

<mosaic_0001>
module attributes {stable_mosaic.version = 11 : i64} {
  func.func @_fused_gap_mlp_kernel(%arg0: i32, %arg1: memref<8x128x256xf32, #tpu.memory_space<vmem>>, %arg2: memref<128x256xf32, #tpu.memory_space<vmem>>, %arg3: memref<1x256xf32, #tpu.memory_space<vmem>>, %arg4: memref<256x256xf32, #tpu.memory_space<vmem>>, %arg5: memref<1x256xf32, #tpu.memory_space<vmem>>, %arg6: memref<256x128xf32, #tpu.memory_space<vmem>>, %arg7: memref<1x128xf32, #tpu.memory_space<vmem>>, %arg8: memref<8x128xf32, #tpu.memory_space<vmem>>) attributes {dimension_semantics = [#tpu.dimension_semantics<arbitrary>], iteration_bounds = array<i64: 1>, scalar_prefetch = 0 : i64, scratch_operands = 0 : i64, tpu.core_type = #tpu.core_type<tc>, window_params = [{pipeline_mode = #tpu.pipeline_mode<synchronous>, transform_indices = @transform_0, window_bounds = array<i64: 8, 128, 256>}, {pipeline_mode = #tpu.pipeline_mode<synchronous>, transform_indices = @transform_1, window_bounds = array<i64: 128, 256>}, {pipeline_mode = #tpu.pipeline_mode<synchronous>, transform_indices = @transform_2, window_bounds = array<i64: 1, 256>}, {pipeline_mode = #tpu.pipeline_mode<synchronous>, transform_indices = @transform_3, window_bounds = array<i64: 256, 256>}, {pipeline_mode = #tpu.pipeline_mode<synchronous>, transform_indices = @transform_4, window_bounds = array<i64: 1, 256>}, {pipeline_mode = #tpu.pipeline_mode<synchronous>, transform_indices = @transform_5, window_bounds = array<i64: 256, 128>}, {pipeline_mode = #tpu.pipeline_mode<synchronous>, transform_indices = @transform_6, window_bounds = array<i64: 1, 128>}, {pipeline_mode = #tpu.pipeline_mode<synchronous>, transform_indices = @transform_7, window_bounds = array<i64: 8, 128>}]} {
    %c0 = arith.constant 0 : index
    %c0_0 = arith.constant 0 : index
    %c0_1 = arith.constant 0 : index
    %0 = vector.load %arg1[%c0, %c0_0, %c0_1] : memref<8x128x256xf32, #tpu.memory_space<vmem>>, vector<8x128x256xf32>
    %cst = arith.constant dense<0.000000e+00> : vector<8x128xf32>
    %1 = vector.multi_reduction <add>, %0, %cst [2] : vector<8x128x256xf32> to vector<8x128xf32>
    %c0_2 = arith.constant 0 : index
    %c0_3 = arith.constant 0 : index
    %2 = vector.load %arg2[%c0_2, %c0_3] : memref<128x256xf32, #tpu.memory_space<vmem>>, vector<128x256xf32>
    %cst_4 = arith.constant dense<0.000000e+00> : vector<8x256xf32>
    %3 = tpu.matmul %1, %2, %cst_4 {dimension_numbers = #tpu.dot_dimension_numbers<[1], [0], [0], [1], [0, 0, 1, 1], [], []>} : vector<8x128xf32>, vector<128x256xf32>, vector<8x256xf32> -> vector<8x256xf32>
    %c0_5 = arith.constant 0 : index
    %c0_6 = arith.constant 0 : index
    %4 = vector.load %arg3[%c0_5, %c0_6] : memref<1x256xf32, #tpu.memory_space<vmem>>, vector<1x256xf32>
    %5 = vector.broadcast %4 : vector<1x256xf32> to vector<8x256xf32>
    %6 = arith.addf %3, %5 : vector<8x256xf32>
    %cst_7 = arith.constant 0.000000e+00 : f32
    %7 = vector.broadcast %cst_7 : f32 to vector<8x256xf32>
    %8 = arith.maximumf %6, %7 : vector<8x256xf32>
    %c0_8 = arith.constant 0 : index
    %c0_9 = arith.constant 0 : index
    %9 = vector.load %arg4[%c0_8, %c0_9] : memref<256x256xf32, #tpu.memory_space<vmem>>, vector<256x256xf32>
    %cst_10 = arith.constant dense<0.000000e+00> : vector<8x256xf32>
    %10 = tpu.matmul %8, %9, %cst_10 {dimension_numbers = #tpu.dot_dimension_numbers<[1], [0], [0], [1], [0, 0, 1, 1], [], []>} : vector<8x256xf32>, vector<256x256xf32>, vector<8x256xf32> -> vector<8x256xf32>
    %c0_11 = arith.constant 0 : index
    %c0_12 = arith.constant 0 : index
    %11 = vector.load %arg5[%c0_11, %c0_12] : memref<1x256xf32, #tpu.memory_space<vmem>>, vector<1x256xf32>
    %12 = vector.broadcast %11 : vector<1x256xf32> to vector<8x256xf32>
    %13 = arith.addf %10, %12 : vector<8x256xf32>
    %cst_13 = arith.constant 0.000000e+00 : f32
    %14 = vector.broadcast %cst_13 : f32 to vector<8x256xf32>
    %15 = arith.maximumf %13, %14 : vector<8x256xf32>
    %c0_14 = arith.constant 0 : index
    %c0_15 = arith.constant 0 : index
    %16 = vector.load %arg6[%c0_14, %c0_15] : memref<256x128xf32, #tpu.memory_space<vmem>>, vector<256x128xf32>
    %cst_16 = arith.constant dense<0.000000e+00> : vector<8x128xf32>
    %17 = tpu.matmul %15, %16, %cst_16 {dimension_numbers = #tpu.dot_dimension_numbers<[1], [0], [0], [1], [0, 0, 1, 1], [], []>} : vector<8x256xf32>, vector<256x128xf32>, vector<8x128xf32> -> vector<8x128xf32>
    %c0_17 = arith.constant 0 : index
    %c0_18 = arith.constant 0 : index
    %18 = vector.load %arg7[%c0_17, %c0_18] : memref<1x128xf32, #tpu.memory_space<vmem>>, vector<1x128xf32>
    %19 = vector.broadcast %18 : vector<1x128xf32> to vector<8x128xf32>
    %20 = arith.addf %17, %19 : vector<8x128xf32>
    %c0_19 = arith.constant 0 : index
    %c0_20 = arith.constant 0 : index
    %21 = vector.load %arg8[%c0_19, %c0_20] : memref<8x128xf32, #tpu.memory_space<vmem>>, vector<8x128xf32>
    tpu.vector_store %arg8[%c0_19, %c0_20], %20 {strides = array<i32>} : memref<8x128xf32, #tpu.memory_space<vmem>>, vector<8x128xf32>,
    return
  }
  func.func @transform_0(%arg0: i32) -> (i32, i32, i32) {
    %c0_i32 = arith.constant 0 : i32
    %c0_i32_0 = arith.constant 0 : i32
    %c0_i32_1 = arith.constant 0 : i32
    %c0_i32_2 = arith.constant 0 : i32
    return %c0_i32, %c0_i32_0, %c0_i32_1 : i32, i32, i32
  }
  func.func @transform_1(%arg0: i32) -> (i32, i32) {
    %c0_i32 = arith.constant 0 : i32
    %c0_i32_0 = arith.constant 0 : i32
    %c0_i32_1 = arith.constant 0 : i32
    return %c0_i32, %c0_i32_0 : i32, i32
  }
  func.func @transform_2(%arg0: i32) -> (i32, i32) {
    %c0_i32 = arith.constant 0 : i32
    %c0_i32_0 = arith.constant 0 : i32
    %c0_i32_1 = arith.constant 0 : i32
    return %c0_i32, %c0_i32_0 : i32, i32
  }
  func.func @transform_3(%arg0: i32) -> (i32, i32) {
    %c0_i32 = arith.constant 0 : i32
    %c0_i32_0 = arith.constant 0 : i32
    %c0_i32_1 = arith.constant 0 : i32
    return %c0_i32, %c0_i32_0 : i32, i32
  }
  func.func @transform_4(%arg0: i32) -> (i32, i32) {
    %c0_i32 = arith.constant 0 : i32
    %c0_i32_0 = arith.constant 0 : i32
    %c0_i32_1 = arith.constant 0 : i32
    return %c0_i32, %c0_i32_0 : i32, i32
  }
  func.func @transform_5(%arg0: i32) -> (i32, i32) {
    %c0_i32 = arith.constant 0 : i32
    %c0_i32_0 = arith.constant 0 : i32
    %c0_i32_1 = arith.constant 0 : i32
    return %c0_i32, %c0_i32_0 : i32, i32
  }
  func.func @transform_6(%arg0: i32) -> (i32, i32) {
    %c0_i32 = arith.constant 0 : i32
    %c0_i32_0 = arith.constant 0 : i32
    %c0_i32_1 = arith.constant 0 : i32
    return %c0_i32, %c0_i32_0 : i32, i32
  }
  func.func @transform_7(%arg0: i32) -> (i32, i32) {
    %c0_i32 = arith.constant 0 : i32
    %c0_i32_0 = arith.constant 0 : i32
    %c0_i32_1 = arith.constant 0 : i32
    return %c0_i32, %c0_i32_0 : i32, i32
  }
}

</mosaic_0001>

<bundles_post_ra>
// kernel: tpu_custom_call.1
= control target key start
LH: loop header
LB: loop body
LE: loop exit
PB: predicated region body
PF: predicated region fallthrough
CT: control target
= control target key end

     0   :  { %12 = vsyncpa [#allocation3], 0  ;;  %s2185_s0 = inlined_call_operand.hbm [shape: f32[8,128,256], index: 0, kind: input, shape index: {}]   ;;  %s2186_s1 = inlined_call_operand.hbm [shape: f32[128,256], index: 1, kind: input, shape index: {}]   ;;  %s2187_s2 = inlined_call_operand.hbm [shape: f32[1,256], index: 2, kind: input, shape index: {}]   ;;  %s2188_s3 = inlined_call_operand.hbm [shape: f32[256,256], index: 3, kind: input, shape index: {}]   ;;  %s2189_s4 = inlined_call_operand.vmem [shape: f32[1,256], index: 4, kind: input, shape index: {}]   ;;  %s2190_s5 = inlined_call_operand.hbm [shape: f32[256,128], index: 5, kind: input, shape index: {}]   ;;  %s2191_s6 = inlined_call_operand.vmem [shape: f32[1,128], index: 6, kind: input, shape index: {}]   ;;  %s2192_s7 = inlined_call_operand.hbm [shape: f32[8,128], index: 7, kind: output, shape index: {}]  }
   0x1   :  { %13 = vsyncpa [#allocation6], 0 }
   0x2   :  { %14 = vsyncpa [#allocation9], 0 }
   0x3   :  { %15 = vsyncpa [#allocation4], 0  ;;  %s33_s26 = sshll.u32 %s2186_s1, 4  ;;  %s1657_s27 = smov [#allocation5]   ;;  %s34_s26 = int_to_ptr.hbm [resolvable:$true] %s33_s26 }
   0x4   :  { %s35_s28 = sshll.u32 %s1657_s27, 4  ;;  %s57_s8 = sshll.u32 %s2188_s3, 4  ;;  %s36_s28 = int_to_ptr.vmem [resolvable:$true] %s35_s28  ;;  %s58_s8 = int_to_ptr.hbm [resolvable:$true] %s57_s8 }
   0x5   :  { %s1658_s9 = smov 256   ;;  %s1659_s10 = smov 16  }
   0x6   :  { %41 = dma.hbm_to_vmem [thread:$0]  %s34_s26, 4096, %s36_s28, [#allocation6], %s1658_s9, %s1658_s9, %s1659_s10  }
   0x7   :  { %s1660_s11 = smov [#allocation8]   ;;  %s20_s15 = sshll.u32 %s2185_s0, 4  ;;  %s21_s15 = int_to_ptr.hbm [resolvable:$true] %s20_s15 }
   0x8   :  { %s59_s12 = sshll.u32 %s1660_s11, 4  ;;  %s47_s17 = sshll.u32 %s2187_s2, 4  ;;  %s60_s12 = int_to_ptr.vmem [resolvable:$true] %s59_s12  ;;  %s48_s17 = int_to_ptr.hbm [resolvable:$true] %s47_s17 }
   0x9   :  { %65 = dma.hbm_to_vmem [thread:$0]  %s58_s8, 8192, %s60_s12, [#allocation9], %s1658_s9, %s1658_s9, %s1659_s10  }
   0xa   :  { %s1661_s18 = smov [#allocation2]   ;;  %s1662_s3 = smov [#allocation7]  }
   0xb   :  { %s22_s19 = sshll.u32 %s1661_s18, 4  ;;  %s49_s20 = sshll.u32 %s1662_s3, 4  ;;  %s23_s19 = int_to_ptr.vmem [resolvable:$true] %s22_s19  ;;  %s50_s20 = int_to_ptr.vmem [resolvable:$true] %s49_s20 }
   0xc   :  { %28 = dma.hbm_to_vmem [thread:$0]  %s21_s15, 32768, %s23_s19, [#allocation3], %s1658_s9, %s1658_s9, %s1659_s10  }
   0xd   :  { %s72_s23 = sshll.u32 %s2190_s5, 4  ;;  %s1663_s0 = smov [#allocation10]   ;;  %s73_s23 = int_to_ptr.hbm [resolvable:$true] %s72_s23 }
   0xe   :  { %52 = dma.hbm_to_vmem [thread:$0]  %s48_s17, 32, %s50_s20, [#allocation6]  }
   0xf   :  { %s74_s24 = sshll.u32 %s1663_s0, 4  ;;  %s1664_s25 = smov 128   ;;  %s75_s24 = int_to_ptr.vmem [resolvable:$true] %s74_s24 }
  0x10   :  { %s1665_s26 = smov 8  }
  0x11   :  { %80 = dma.hbm_to_vmem [thread:$0]  %s73_s23, 4096, %s75_s24, [#allocation9], %s1664_s25, %s1664_s25, %s1665_s26  }
  0x12   :  { %1649 = dma.done.wait [#allocation3], 32768  }
  0x13   :  { %1650 = vsyncadd [#allocation3], 4294934528 }
  0x14   :  { %1651 = dma.done.wait [#allocation6], 4128  }
  0x15   :  { %1652 = vsyncadd [#allocation6], 4294963168 }
  0x16   :  { %1653 = dma.done.wait [#allocation9], 12288  }
  0x17   :  { %1654 = vsyncadd [#allocation9], 4294955008  ;;  %v135_v0 = vld [vmem:[#allocation2 + $0x100] sm:$0xff]  ;;  %v136_v1 = vld [vmem:[#allocation2 + $0x108] sm:$0xff]  ;;  %vm914_vm0 = vcmask 130112   ;;  %vm918_vm1 = vcmask 195712  }
  0x18   :  { %v107_v2 = vld [vmem:[#allocation2 + $0x20] sm:$0xff]  ;;  %v407_v3 = vadd.f32 %v136_v1, %v135_v0  ;;  %v108_v4 = vld [vmem:[#allocation2 + $0x28] sm:$0xff]  ;;  %v137_v9 = vld [vmem:[#allocation2 + $0x110] sm:$0xff]  ;;  %vm922_vm2 = vcmask 261312   ;;  %vm926_vm3 = vcmask 326912   ;;  %vm930_vm4 = vcmask 392512  }
  0x19   :  { %v103_v5 = vld [vmem:[#allocation2] sm:$0xff]  ;;  %v104_v6 = vld [vmem:[#allocation2 + $0x8] sm:$0xff]  ;;  %v365_v7 = vadd.f32 %v108_v4, %v107_v2  ;;  %v138_v10 = vld [vmem:[#allocation2 + $0x118] sm:$0xff]  ;;  %vm934_vm5 = vcmask 458112   ;;  %vm938_vm6 = vcmask 523712   ;;  %vm942_vm7 = vcmask 589312  }
  0x1a   :  { %v359_v8 = vadd.f32 %v104_v6, %v103_v5  ;;  %408 = vadd.xlane.f32.xlu1 %v407_v3  ;;  %v139_v11 = vld [vmem:[#allocation2 + $0x120] sm:$0xff]  ;;  %v140_v12 = vld [vmem:[#allocation2 + $0x128] sm:$0xff]  ;;  %v105_v13 = vld [vmem:[#allocation2 + $0x10] sm:$0xff]  ;;  %v410_v15 = vadd.f32 %v138_v10, %v137_v9  ;;  %vm946_vm8 = vcmask 654912   ;;  %vm950_vm9 = vcmask 720512   ;;  %s1482_s9 = sshll.u32 %s2192_s7, 4  ;;  %s1483_s9 = int_to_ptr.hbm [resolvable:$true] %s1482_s9 }
  0x1b   :  { %366 = vadd.xlane.f32.xlu2 %v365_v7  ;;  %v106_v14 = vld [vmem:[#allocation2 + $0x18] sm:$0xff]  ;;  %v413_v16 = vadd.f32 %v140_v12, %v139_v11  ;;  %v169_v18 = vld [vmem:[#allocation2 + $0x210] sm:$0xff]  ;;  %v167_v22 = vld [vmem:[#allocation2 + $0x200] sm:$0xff]  ;;  %vm954_vm10 = vcmask 786112   ;;  %vm958_vm11 = vcmask 851712   ;;  %vm962_vm12 = vcmask 917312  }
  0x1c   :  { %360 = vadd.xlane.f32.xlu0 %v359_v8  ;;  %v362_v17 = vadd.f32 %v106_v14, %v105_v13  ;;  %v170_v19 = vld [vmem:[#allocation2 + $0x218] sm:$0xff]  ;;  %v109_v20 = vld [vmem:[#allocation2 + $0x30] sm:$0xff]  ;;  %v168_v23 = vld [vmem:[#allocation2 + $0x208] sm:$0xff]  ;;  %vm966_vm13 = vcmask 982912   ;;  %vm970_vm14 = vcmask 1048512   ;;  %vm1189_vm15 = vcmask 1041409  }
  0x1d   :  { %v110_v21 = vld [vmem:[#allocation2 + $0x38] sm:$0xff]  ;;  %v458_v24 = vadd.f32 %v170_v19, %v169_v18  ;;  %v455_v26 = vadd.f32 %v168_v23, %v167_v22  ;;  %v171_v27 = vld [vmem:[#allocation2 + $0x220] sm:$0xff]  ;;  %v172_v28 = vld [vmem:[#allocation2 + $0x228] sm:$0xff] }
  0x1e   :  { %v368_v25 = vadd.f32 %v110_v21, %v109_v20  ;;  %v199_v29 = vld [vmem:[#allocation2 + $0x300] sm:$0xff]  ;;  %v200_v30 = vld [vmem:[#allocation2 + $0x308] sm:$0xff]  ;;  %v141_v31 = vld [vmem:[#allocation2 + $0x130] sm:$0xff]  ;;  %v461_v33 = vadd.f32 %v172_v28, %v171_v27 }
  0x1f   :  { %v142_v32 = vld [vmem:[#allocation2 + $0x138] sm:$0xff]  ;;  %v503_v34 = vadd.f32 %v200_v30, %v199_v29  ;;  %v111_v36 = vld [vmem:[#allocation2 + $0x40] sm:$0xff]  ;;  %v112_v37 = vld [vmem:[#allocation2 + $0x48] sm:$0xff] }
  0x20   :  { %v416_v35 = vadd.f32 %v142_v32, %v141_v31  ;;  %v143_v38 = vld [vmem:[#allocation2 + $0x140] sm:$0xff]  ;;  %v144_v39 = vld [vmem:[#allocation2 + $0x148] sm:$0xff]  ;;  %v201_v40 = vld [vmem:[#allocation2 + $0x310] sm:$0xff]  ;;  %v371_v42 = vadd.f32 %v112_v37, %v111_v36 }
  0x21   :  { %v202_v41 = vld [vmem:[#allocation2 + $0x318] sm:$0xff]  ;;  %v419_v43 = vadd.f32 %v144_v39, %v143_v38  ;;  %v203_v45 = vld [vmem:[#allocation2 + $0x320] sm:$0xff]  ;;  %v204_v46 = vld [vmem:[#allocation2 + $0x328] sm:$0xff] }
  0x22   :  { %411 = vadd.xlane.f32.xlu1 %v410_v15  ;;  %v506_v44 = vadd.f32 %v202_v41, %v201_v40  ;;  %v231_v47 = vld [vmem:[#allocation2 + $0x400] sm:$0xff]  ;;  %v232_v48 = vld [vmem:[#allocation2 + $0x408] sm:$0xff]  ;;  %v173_v49 = vld [vmem:[#allocation2 + $0x230] sm:$0xff]  ;;  %v509_v51 = vadd.f32 %v204_v46, %v203_v45 }
  0x23   :  { %414 = vadd.xlane.f32.xlu2 %v413_v16  ;;  %v174_v50 = vld [vmem:[#allocation2 + $0x238] sm:$0xff]  ;;  %v551_v52 = vadd.f32 %v232_v48, %v231_v47  ;;  %v113_v54 = vld [vmem:[#allocation2 + $0x50] sm:$0xff]  ;;  %v235_v1 = vld [vmem:[#allocation2 + $0x420] sm:$0xff] }
  0x24   :  { %363 = vadd.xlane.f32.xlu0 %v362_v17  ;;  %v464_v53 = vadd.f32 %v174_v50, %v173_v49  ;;  %v114_v55 = vld [vmem:[#allocation2 + $0x58] sm:$0xff]  ;;  %v145_v56 = vld [vmem:[#allocation2 + $0x150] sm:$0xff]  ;;  %v236_v2 = vld [vmem:[#allocation2 + $0x428] sm:$0xff] }
  0x25   :  { %v146_v57 = vld [vmem:[#allocation2 + $0x158] sm:$0xff]  ;;  %v233_v58 = vld [vmem:[#allocation2 + $0x410] sm:$0xff]  ;;  %v374_v60 = vadd.f32 %v114_v55, %v113_v54  ;;  %v175_v3 = vld [vmem:[#allocation2 + $0x240] sm:$0xff]  ;;  %v557_v6 = vadd.f32 %v236_v2, %v235_v1 }
  0x26   :  { %v234_v59 = vld [vmem:[#allocation2 + $0x418] sm:$0xff]  ;;  %v422_v61 = vadd.f32 %v146_v57, %v145_v56  ;;  %v205_v63 = vld [vmem:[#allocation2 + $0x330] sm:$0xff]  ;;  %v176_v4 = vld [vmem:[#allocation2 + $0x248] sm:$0xff] }
  0x27   :  { %v554_v62 = vadd.f32 %v234_v59, %v233_v58  ;;  %v206_v0 = vld [vmem:[#allocation2 + $0x338] sm:$0xff]  ;;  %v467_v7 = vadd.f32 %v176_v4, %v175_v3  ;;  %v265_v8 = vld [vmem:[#allocation2 + $0x510] sm:$0xff]  ;;  %v115_v10 = vld [vmem:[#allocation2 + $0x60] sm:$0xff] }
  0x28   :  { %v512_v5 = vadd.f32 %v206_v0, %v205_v63  ;;  %v266_v9 = vld [vmem:[#allocation2 + $0x518] sm:$0xff]  ;;  %v116_v11 = vld [vmem:[#allocation2 + $0x68] sm:$0xff]  ;;  %v263_v12 = vld [vmem:[#allocation2 + $0x500] sm:$0xff] }
  0x29   :  { %v264_v13 = vld [vmem:[#allocation2 + $0x508] sm:$0xff]  ;;  %v602_v14 = vadd.f32 %v266_v9, %v265_v8  ;;  %v377_v15 = vadd.f32 %v116_v11, %v115_v10  ;;  %v177_v17 = vld [vmem:[#allocation2 + $0x250] sm:$0xff]  ;;  %v178_v18 = vld [vmem:[#allocation2 + $0x258] sm:$0xff]  ;;  %v909_v10 = vlaneseq }
  0x2a   :  { %459 = vadd.xlane.f32.xlu1 %v458_v24  ;;  %v599_v16 = vadd.f32 %v264_v13, %v263_v12  ;;  %v207_v19 = vld [vmem:[#allocation2 + $0x340] sm:$0xff]  ;;  %v208_v20 = vld [vmem:[#allocation2 + $0x348] sm:$0xff]  ;;  %v470_v23 = vadd.f32 %v178_v18, %v177_v17  ;;  %v237_v30 = vld [vmem:[#allocation2 + $0x430] sm:$0xff] }
  0x2b   :  { %369 = vadd.xlane.f32.xlu2 %v368_v25  ;;  %v147_v21 = vld [vmem:[#allocation2 + $0x160] sm:$0xff]  ;;  %v148_v22 = vld [vmem:[#allocation2 + $0x168] sm:$0xff]  ;;  %v515_v24 = vadd.f32 %v208_v20, %v207_v19  ;;  %v238_v31 = vld [vmem:[#allocation2 + $0x438] sm:$0xff]  ;;  %v1722_v20 = vand.u32 127, %v909_v10 }
  0x2c   :  { %456 = vadd.xlane.f32.xlu0 %v455_v26  ;;  %v425_v25 = vadd.f32 %v148_v22, %v147_v21  ;;  %v267_v26 = vld [vmem:[#allocation2 + $0x520] sm:$0xff]  ;;  %v268_v27 = vld [vmem:[#allocation2 + $0x528] sm:$0xff]  ;;  %v118_v36 = vld [vmem:[#allocation2 + $0x78] sm:$0xff] }
  0x2d   :  { %v295_v28 = vld [vmem:[#allocation2 + $0x600] sm:$0xff]  ;;  %v296_v29 = vld [vmem:[#allocation2 + $0x608] sm:$0xff]  ;;  %v605_v32 = vadd.f32 %v268_v27, %v267_v26  ;;  %v149_v37 = vld [vmem:[#allocation2 + $0x170] sm:$0xff]  ;;  %v1725_v21 = vadd.s32 4294967280, %v1722_v20  ;;  %v1728_v22 = vadd.s32 4294967288, %v1722_v20 }
  0x2e   :  { %v150_v38 = vld [vmem:[#allocation2 + $0x178] sm:$0xff]  ;;  %v297_v39 = vld [vmem:[#allocation2 + $0x610] sm:$0xff]  ;;  %v239_v46 = vld [vmem:[#allocation2 + $0x440] sm:$0xff] }
  0x2f   :  { %v298_v40 = vld [vmem:[#allocation2 + $0x618] sm:$0xff]  ;;  %v240_v47 = vld [vmem:[#allocation2 + $0x448] sm:$0xff]  ;;  %v179_v48 = vld [vmem:[#allocation2 + $0x260] sm:$0xff] }
  0x30   :  { %v210_v45 = vld [vmem:[#allocation2 + $0x358] sm:$0xff]  ;;  %v180_v49 = vld [vmem:[#allocation2 + $0x268] sm:$0xff]  ;;  %v327_v55 = vld [vmem:[#allocation2 + $0x700] sm:$0xff] }
  0x31   :  { %v300_v54 = vld [vmem:[#allocation2 + $0x628] sm:$0xff]  ;;  %v269_v57 = vld [vmem:[#allocation2 + $0x530] sm:$0xff]  ;;  %v270_v58 = vld [vmem:[#allocation2 + $0x538] sm:$0xff] }
  0x32   :  { %462 = vadd.xlane.f32.xlu1 %v461_v33  ;;  %v647_v33 = vadd.f32 %v296_v29, %v295_v28  ;;  %v328_v56 = vld [vmem:[#allocation2 + $0x708] sm:$0xff]  ;;  %v151_v0 = vld [vmem:[#allocation2 + $0x180] sm:$0xff]  ;;  %v329_v2 = vld [vmem:[#allocation2 + $0x710] sm:$0xff] }
  0x33   :  { %504 = vadd.xlane.f32.xlu2 %v503_v34  ;;  %v560_v34 = vadd.f32 %v238_v31, %v237_v30  ;;  %v120_v63 = vld [vmem:[#allocation2 + $0x88] sm:$0xff]  ;;  %v330_v3 = vld [vmem:[#allocation2 + $0x718] sm:$0xff]  ;;  %v241_v9 = vld [vmem:[#allocation2 + $0x450] sm:$0xff] }
  0x34   :  { %417 = vadd.xlane.f32.xlu0 %v416_v35  ;;  %v117_v35 = vld [vmem:[#allocation2 + $0x70] sm:$0xff]  ;;  %v152_v1 = vld [vmem:[#allocation2 + $0x188] sm:$0xff]  ;;  %v242_v11 = vld [vmem:[#allocation2 + $0x458] sm:$0xff] }
  0x35   :  { %v380_v41 = vadd.f32 %v118_v36, %v117_v35  ;;  %v212_v8 = vld [vmem:[#allocation2 + $0x368] sm:$0xff]  ;;  %v181_v12 = vld [vmem:[#allocation2 + $0x270] sm:$0xff]  ;;  %v182_v13 = vld [vmem:[#allocation2 + $0x278] sm:$0xff]  ;;  %v566_v18 = vadd.f32 %v242_v11, %v241_v9 }
  0x36   :  { %v476_v19 = vadd.f32 %v182_v13, %v181_v12  ;;  %v332_v26 = vld [vmem:[#allocation2 + $0x728] sm:$0xff]  ;;  %v271_v27 = vld [vmem:[#allocation2 + $0x540] sm:$0xff] }
  0x37   :  { %v272_v28 = vld [vmem:[#allocation2 + $0x548] sm:$0xff] }
  0x3a   :  { %372 = vadd.xlane.f32.xlu1 %v371_v42  ;;  %v428_v42 = vadd.f32 %v150_v38, %v149_v37 }
  0x3b   :  { %420 = vadd.xlane.f32.xlu2 %v419_v43  ;;  %v650_v43 = vadd.f32 %v298_v40, %v297_v39  ;;  %v611_v40 = vadd.f32 %v272_v28, %v271_v27 }
  0x3c   :  { %507 = vadd.xlane.f32.xlu0 %v506_v44  ;;  %v209_v44 = vld [vmem:[#allocation2 + $0x350] sm:$0xff] }
  0x3d   :  { %v518_v50 = vadd.f32 %v210_v45, %v209_v44  ;;  %v1741_v45 = vadd.s32 4294967272, %v1722_v20 }
  0x42   :  { %510 = vadd.xlane.f32.xlu1 %v509_v51  ;;  %v563_v51 = vadd.f32 %v240_v47, %v239_v46  ;;  %v153_v46 = vld [vmem:[#allocation2 + $0x190] sm:$0xff]  ;;  %v154_v47 = vld [vmem:[#allocation2 + $0x198] sm:$0xff] }
  0x43   :  { %552 = vadd.xlane.f32.xlu2 %v551_v52  ;;  %v473_v52 = vadd.f32 %v180_v49, %v179_v48  ;;  %v183_v48 = vld [vmem:[#allocation2 + $0x280] sm:$0xff]  ;;  %v184_v49 = vld [vmem:[#allocation2 + $0x288] sm:$0xff] }
  0x44   :  { %465 = vadd.xlane.f32.xlu0 %v464_v53  ;;  %v299_v53 = vld [vmem:[#allocation2 + $0x620] sm:$0xff] }
  0x45   :  { %v653_v59 = vadd.f32 %v300_v54, %v299_v53 }
  0x4a   :  { %375 = vadd.xlane.f32.xlu1 %v374_v60  ;;  %v695_v60 = vadd.f32 %v328_v56, %v327_v55  ;;  %v434_v56 = vadd.f32 %v154_v47, %v153_v46 }
  0x4b   :  { %423 = vadd.xlane.f32.xlu2 %v422_v61  ;;  %v608_v61 = vadd.f32 %v270_v58, %v269_v57 }
  0x4c   :  { %555 = vadd.xlane.f32.xlu0 %v554_v62  ;;  %v119_v62 = vld [vmem:[#allocation2 + $0x80] sm:$0xff] }
  0x4d   :  { %v383_v4 = vadd.f32 %v120_v63, %v119_v62  ;;  %v243_v63 = vld [vmem:[#allocation2 + $0x460] sm:$0xff] }
  0x52   :  { %513 = vadd.xlane.f32.xlu1 %v512_v5  ;;  %v431_v5 = vadd.f32 %v152_v1, %v151_v0  ;;  %v244_v0 = vld [vmem:[#allocation2 + $0x468] sm:$0xff]  ;;  %v273_v1 = vld [vmem:[#allocation2 + $0x550] sm:$0xff] }
  0x53   :  { %558 = vadd.xlane.f32.xlu2 %v557_v6  ;;  %v698_v6 = vadd.f32 %v330_v3, %v329_v2  ;;  %v274_v2 = vld [vmem:[#allocation2 + $0x558] sm:$0xff]  ;;  %v213_v3 = vld [vmem:[#allocation2 + $0x370] sm:$0xff]  ;;  %v569_v9 = vadd.f32 %v244_v0, %v243_v63 }
  0x54   :  { %468 = vadd.xlane.f32.xlu0 %v467_v7  ;;  %v211_v7 = vld [vmem:[#allocation2 + $0x360] sm:$0xff]  ;;  %v614_v11 = vadd.f32 %v274_v2, %v273_v1 }
  0x55   :  { %v521_v17 = vadd.f32 %v212_v8, %v211_v7 }
  0x5a   :  { %603 = vadd.xlane.f32.xlu1 %v602_v14 }
  0x5b   :  { %378 = vadd.xlane.f32.xlu2 %v377_v15 }
  0x5c   :  { %600 = vadd.xlane.f32.xlu0 %v599_v16 }
  0x62   :  { %471 = vadd.xlane.f32.xlu1 %v470_v23  ;;  %v301_v23 = vld [vmem:[#allocation2 + $0x630] sm:$0xff] }
  0x63   :  { %516 = vadd.xlane.f32.xlu2 %v515_v24  ;;  %v302_v24 = vld [vmem:[#allocation2 + $0x638] sm:$0xff] }
  0x64   :  { %426 = vadd.xlane.f32.xlu0 %v425_v25  ;;  %v331_v25 = vld [vmem:[#allocation2 + $0x720] sm:$0xff]  ;;  %v656_v30 = vadd.f32 %v302_v24, %v301_v23  ;;  %v304_v24 = vld [vmem:[#allocation2 + $0x648] sm:$0xff] }
  0x65   :  { %v701_v36 = vadd.f32 %v332_v26, %v331_v25  ;;  %v303_v23 = vld [vmem:[#allocation2 + $0x640] sm:$0xff] }
  0x6a   :  { %606 = vadd.xlane.f32.xlu1 %v605_v32 }
  0x6b   :  { %648 = vadd.xlane.f32.xlu2 %v647_v33 }
  0x6c   :  { %561 = vadd.xlane.f32.xlu0 %v560_v34 }
  0x72   :  { %381 = vadd.xlane.f32.xlu1 %v380_v41 }
  0x73   :  { %429 = vadd.xlane.f32.xlu2 %v428_v42 }
  0x74   :  { %651 = vadd.xlane.f32.xlu0 %v650_v43 }
  0x7a   :  { %519 = vadd.xlane.f32.xlu1 %v518_v50  ;;  %v121_v50 = vld [vmem:[#allocation2 + $0x90] sm:$0xff] }
  0x7b   :  { %564 = vadd.xlane.f32.xlu2 %v563_v51  ;;  %v122_v51 = vld [vmem:[#allocation2 + $0x98] sm:$0xff] }
  0x7c   :  { %474 = vadd.xlane.f32.xlu0 %v473_v52 }
  0x82   :  { %654 = vadd.xlane.f32.xlu1 %v653_v59  ;;  %v479_v59 = vadd.f32 %v184_v49, %v183_v48 }
  0x83   :  { %696 = vadd.xlane.f32.xlu2 %v695_v60  ;;  %v386_v60 = vadd.f32 %v122_v51, %v121_v50 }
  0x84   :  { %609 = vadd.xlane.f32.xlu0 %v608_v61 }
  0x8a   :  { %384 = vadd.xlane.f32.xlu1 %v383_v4  ;;  %v214_v4 = vld [vmem:[#allocation2 + $0x378] sm:$0xff] }
  0x8b   :  { %432 = vadd.xlane.f32.xlu2 %v431_v5  ;;  %v524_v12 = vadd.f32 %v214_v4, %v213_v3 }
  0x8c   :  { %699 = vadd.xlane.f32.xlu0 %v698_v6 }
  0x8d   :  { %v409_v14 = vpop.xlane.xlu1 %408 }
  0x8e   :  { %v367_v15 = vpop.xlane.xlu2 %366  ;;  %v972_v31 = vperm.slane %v409_v14, %v1722_v20 }
  0x8f   :  { %v361_v16 = vpop.xlane.xlu0 %360  ;;  %v917_v32 = vperm.slane %v367_v15, %v1725_v21  ;;  %v1753_v15 = vadd.s32 4294967264, %v1722_v20 }
  0x90   :  { %v911_v37 = vperm.slane %v361_v16, %v1722_v20  ;;  %v333_v16 = vld [vmem:[#allocation2 + $0x730] sm:$0xff] }
  0x92   :  { %522 = vadd.xlane.f32.xlu1 %v521_v17  ;;  %v334_v17 = vld [vmem:[#allocation2 + $0x738] sm:$0xff] }
  0x93   :  { %567 = vadd.xlane.f32.xlu2 %v566_v18  ;;  %v123_v18 = vld [vmem:[#allocation2 + $0xa0] sm:$0xff] }
  0x94   :  { %477 = vadd.xlane.f32.xlu0 %v476_v19  ;;  %v124_v19 = vld [vmem:[#allocation2 + $0xa8] sm:$0xff] }
  0x95   :  { %v412_v29 = vpop.xlane.xlu1 %411 }
  0x96   :  { %v973_v33 = vperm.slane %v412_v29, %v1728_v22  ;;  %v415_v34 = vpop.xlane.xlu2 %414 }
  0x97   :  { %v364_v35 = vpop.xlane.xlu0 %363  ;;  %v975_v38 = vperm.slane %v415_v34, %v1725_v21  ;;  %v659_v34 = vadd.f32 %v304_v24, %v303_v23 }
  0x98   :  { %v913_v39 = vperm.slane %v364_v35, %v1728_v22  ;;  %v974_v41 = vsel %vm914_vm0, %v973_v33, %v972_v31  ;;  %v389_v33 = vadd.f32 %v124_v19, %v123_v18 }
  0x99   :  { %v976_v42 = vsel %vm918_vm1, %v975_v38, %v974_v41  ;;  %v185_v38 = vld [vmem:[#allocation2 + $0x290] sm:$0xff]  ;;  %v216_v41 = vld [vmem:[#allocation2 + $0x388] sm:$0xff] }
  0x9a   :  { %v915_v43 = vsel %vm914_vm0, %v913_v39, %v911_v37  ;;  %657 = vadd.xlane.f32.xlu1 %v656_v30  ;;  %v704_v30 = vadd.f32 %v334_v17, %v333_v16  ;;  %v186_v39 = vld [vmem:[#allocation2 + $0x298] sm:$0xff]  ;;  %v335_v16 = vld [vmem:[#allocation2 + $0x740] sm:$0xff]  ;;  %v336_v17 = vld [vmem:[#allocation2 + $0x748] sm:$0xff] }
  0x9b   :  { %v919_v44 = vsel %vm918_vm1, %v917_v32, %v915_v43  ;;  %702 = vadd.xlane.f32.xlu2 %v701_v36  ;;  %v156_v43 = vld [vmem:[#allocation2 + $0x1a8] sm:$0xff]  ;;  %v482_v49 = vadd.f32 %v186_v39, %v185_v38  ;;  %v187_v38 = vld [vmem:[#allocation2 + $0x2a0] sm:$0xff] }
  0x9c   :  { %612 = vadd.xlane.f32.xlu0 %v611_v40  ;;  %v215_v40 = vld [vmem:[#allocation2 + $0x380] sm:$0xff]  ;;  %v188_v39 = vld [vmem:[#allocation2 + $0x2a8] sm:$0xff] }
  0x9d   :  { %v460_v52 = vpop.xlane.xlu1 %459  ;;  %v527_v51 = vadd.f32 %v216_v41, %v215_v40 }
  0x9e   :  { %v1004_v53 = vperm.slane %v460_v52, %v1728_v22  ;;  %v370_v54 = vpop.xlane.xlu2 %369 }
  0x9f   :  { %v457_v55 = vpop.xlane.xlu0 %456  ;;  %v921_v57 = vperm.slane %v370_v54, %v1741_v45 }
  0xa0   :  { %v1003_v58 = vperm.slane %v457_v55, %v1722_v20  ;;  %v1767_v55 = vadd.s32 4294967256, %v1722_v20 }
  0xa1   :  { %v923_v61 = vsel %vm922_vm2, %v921_v57, %v919_v44  ;;  %v276_v57 = vld [vmem:[#allocation2 + $0x568] sm:$0xff] }
  0xa2   :  { %v1005_v62 = vsel %vm914_vm0, %v1004_v53, %v1003_v58  ;;  %435 = vadd.xlane.f32.xlu1 %v434_v56  ;;  %v275_v56 = vld [vmem:[#allocation2 + $0x560] sm:$0xff]  ;;  %v305_v58 = vld [vmem:[#allocation2 + $0x650] sm:$0xff] }
  0xa3   :  { %480 = vadd.xlane.f32.xlu2 %v479_v59  ;;  %v306_v59 = vld [vmem:[#allocation2 + $0x658] sm:$0xff]  ;;  %v617_v3 = vadd.f32 %v276_v57, %v275_v56  ;;  %v277_v57 = vld [vmem:[#allocation2 + $0x570] sm:$0xff] }
  0xa4   :  { %387 = vadd.xlane.f32.xlu0 %v386_v60  ;;  %v245_v60 = vld [vmem:[#allocation2 + $0x470] sm:$0xff]  ;;  %v338_v56 = vld [vmem:[#allocation2 + $0x758] sm:$0xff] }
  0xa5   :  { %v463_v5 = vpop.xlane.xlu1 %462 }
  0xa6   :  { %v1006_v6 = vperm.slane %v463_v5, %v1725_v21  ;;  %v505_v7 = vpop.xlane.xlu2 %504 }
  0xa7   :  { %v418_v8 = vpop.xlane.xlu0 %417  ;;  %v1034_v25 = vperm.slane %v505_v7, %v1722_v20 }
  0xa8   :  { %v977_v10 = vperm.slane %v418_v8, %v1741_v45  ;;  %v1007_v13 = vsel %vm918_vm1, %v1006_v6, %v1005_v62  ;;  %v662_v6 = vadd.f32 %v306_v59, %v305_v58  ;;  %v278_v58 = vld [vmem:[#allocation2 + $0x578] sm:$0xff] }
  0xaa   :  { %v978_v14 = vsel %vm922_vm2, %v977_v10, %v976_v42  ;;  %570 = vadd.xlane.f32.xlu1 %v569_v9  ;;  %v155_v42 = vld [vmem:[#allocation2 + $0x1a0] sm:$0xff] }
  0xab   :  { %615 = vadd.xlane.f32.xlu2 %v614_v11  ;;  %v437_v52 = vadd.f32 %v156_v43, %v155_v42  ;;  %v125_v11 = vld [vmem:[#allocation2 + $0xb0] sm:$0xff] }
  0xac   :  { %525 = vadd.xlane.f32.xlu0 %v524_v12  ;;  %v126_v12 = vld [vmem:[#allocation2 + $0xb8] sm:$0xff] }
  0xad   :  { %v373_v26 = vpop.xlane.xlu1 %372 }
  0xae   :  { %v925_v27 = vperm.slane %v373_v26, %v1753_v15  ;;  %v421_v28 = vpop.xlane.xlu2 %420 }
  0xaf   :  { %v508_v29 = vpop.xlane.xlu0 %507  ;;  %v979_v31 = vperm.slane %v421_v28, %v1753_v15 }
  0xb0   :  { %v1035_v32 = vperm.slane %v508_v29, %v1728_v22  ;;  %v927_v35 = vsel %vm926_vm3, %v925_v27, %v923_v61  ;;  %v246_v61 = vld [vmem:[#allocation2 + $0x478] sm:$0xff]  ;;  %v707_v29 = vadd.f32 %v336_v17, %v335_v16 }
  0xb1   :  { %v980_v36 = vsel %vm926_vm3, %v979_v31, %v978_v14  ;;  %v572_v7 = vadd.f32 %v246_v61, %v245_v60  ;;  %v158_v14 = vld [vmem:[#allocation2 + $0x1b8] sm:$0xff] }
  0xb2   :  { %v1036_v37 = vsel %vm914_vm0, %v1035_v32, %v1034_v25  ;;  %705 = vadd.xlane.f32.xlu1 %v704_v30  ;;  %v392_v25 = vadd.f32 %v126_v12, %v125_v11  ;;  %v190_v11 = vld [vmem:[#allocation2 + $0x2b8] sm:$0xff]  ;;  %v127_v12 = vld [vmem:[#allocation2 + $0xc0] sm:$0xff] }
  0xb3   :  { %390 = vadd.xlane.f32.xlu2 %v389_v33  ;;  %v1787_v33 = vadd.s32 4294967248, %v1722_v20 }
  0xb4   :  { %660 = vadd.xlane.f32.xlu0 %v659_v34  ;;  %v217_v34 = vld [vmem:[#allocation2 + $0x390] sm:$0xff] }
  0xb5   :  { %v511_v44 = vpop.xlane.xlu1 %510 }
  0xb6   :  { %v1037_v46 = vperm.slane %v511_v44, %v1725_v21  ;;  %v553_v47 = vpop.xlane.xlu2 %552 }
  0xb7   :  { %v466_v48 = vpop.xlane.xlu0 %465  ;;  %v1065_v62 = vperm.slane %v553_v47, %v1722_v20 }
  0xb8   :  { %v1008_v50 = vperm.slane %v466_v48, %v1741_v45  ;;  %v1038_v53 = vsel %vm918_vm1, %v1037_v46, %v1036_v37  ;;  %v248_v37 = vld [vmem:[#allocation2 + $0x488] sm:$0xff] }
  0xba   :  { %v1009_v54 = vsel %vm922_vm2, %v1008_v50, %v1007_v13  ;;  %483 = vadd.xlane.f32.xlu1 %v482_v49  ;;  %v157_v13 = vld [vmem:[#allocation2 + $0x1b0] sm:$0xff]  ;;  %v485_v49 = vadd.f32 %v188_v39, %v187_v38 }
  0xbb   :  { %528 = vadd.xlane.f32.xlu2 %v527_v51  ;;  %v440_v28 = vadd.f32 %v158_v14, %v157_v13  ;;  %v128_v13 = vld [vmem:[#allocation2 + $0xc8] sm:$0xff] }
  0xbc   :  { %438 = vadd.xlane.f32.xlu0 %v437_v52  ;;  %v307_v52 = vld [vmem:[#allocation2 + $0x660] sm:$0xff] }
  0xbd   :  { %v376_v63 = vpop.xlane.xlu1 %375 }
  0xbe   :  { %v929_v0 = vperm.slane %v376_v63, %v1767_v55  ;;  %v424_v1 = vpop.xlane.xlu2 %423 }
  0xbf   :  { %v556_v2 = vpop.xlane.xlu0 %555  ;;  %v981_v4 = vperm.slane %v424_v1, %v1767_v55 }
  0xc0   :  { %v1066_v5 = vperm.slane %v556_v2, %v1728_v22  ;;  %v931_v8 = vsel %vm930_vm4, %v929_v0, %v927_v35  ;;  %v218_v35 = vld [vmem:[#allocation2 + $0x398] sm:$0xff] }
  0xc1   :  { %v1775_v9 = vsel %vm930_vm4, %v981_v4, %v980_v36  ;;  %v247_v36 = vld [vmem:[#allocation2 + $0x480] sm:$0xff]  ;;  %v530_v44 = vadd.f32 %v218_v35, %v217_v34  ;;  %v220_v35 = vld [vmem:[#allocation2 + $0x3a8] sm:$0xff] }
  0xc2   :  { %v1067_v10 = vsel %vm914_vm0, %v1066_v5, %v1065_v62  ;;  %618 = vadd.xlane.f32.xlu1 %v617_v3  ;;  %v575_v48 = vadd.f32 %v248_v37, %v247_v36  ;;  %v620_v3 = vadd.f32 %v278_v58, %v277_v57  ;;  %v219_v34 = vld [vmem:[#allocation2 + $0x3a0] sm:$0xff] }
  0xc3   :  { %663 = vadd.xlane.f32.xlu2 %v662_v6 }
  0xc4   :  { %573 = vadd.xlane.f32.xlu0 %v572_v7  ;;  %v159_v7 = vld [vmem:[#allocation2 + $0x1c0] sm:$0xff] }
  0xc5   :  { %v514_v18 = vpop.xlane.xlu1 %513 }
  0xc6   :  { %v1039_v19 = vperm.slane %v514_v18, %v1741_v45  ;;  %v559_v23 = vpop.xlane.xlu2 %558 }
  0xc7   :  { %v469_v24 = vpop.xlane.xlu0 %468  ;;  %v1068_v26 = vperm.slane %v559_v23, %v1725_v21 }
  0xc8   :  { %v1010_v27 = vperm.slane %v469_v24, %v1753_v15  ;;  %v1040_v30 = vsel %vm922_vm2, %v1039_v19, %v1038_v53  ;;  %v308_v53 = vld [vmem:[#allocation2 + $0x668] sm:$0xff] }
  0xc9   :  { %v1783_v31 = vsel %vm918_vm1, %v1068_v26, %v1067_v10  ;;  %v665_v63 = vadd.f32 %v308_v53, %v307_v52  ;;  %v189_v10 = vld [vmem:[#allocation2 + $0x2b0] sm:$0xff]  ;;  %v130_v53 = vld [vmem:[#allocation2 + $0xd8] sm:$0xff] }
  0xca   :  { %v1011_v32 = vsel %vm926_vm3, %v1010_v27, %v1009_v54  ;;  %393 = vadd.xlane.f32.xlu1 %v392_v25  ;;  %v337_v54 = vld [vmem:[#allocation2 + $0x750] sm:$0xff]  ;;  %v488_v24 = vadd.f32 %v190_v11, %v189_v10  ;;  %v395_v25 = vadd.f32 %v128_v13, %v127_v12  ;;  %v1815_v27 = vadd.s32 4294967240, %v1722_v20  ;;  %v222_v10 = vld [vmem:[#allocation2 + $0x3b8] sm:$0xff] }
  0xcb   :  { %441 = vadd.xlane.f32.xlu2 %v440_v28  ;;  %v710_v2 = vadd.f32 %v338_v56, %v337_v54  ;;  %v249_v28 = vld [vmem:[#allocation2 + $0x490] sm:$0xff]  ;;  %v310_v56 = vld [vmem:[#allocation2 + $0x678] sm:$0xff] }
  0xcc   :  { %708 = vadd.xlane.f32.xlu0 %v707_v29  ;;  %v250_v29 = vld [vmem:[#allocation2 + $0x498] sm:$0xff]  ;;  %v129_v52 = vld [vmem:[#allocation2 + $0xd0] sm:$0xff] }
  0xcd   :  { %v604_v40 = vpop.xlane.xlu1 %603  ;;  %v309_v54 = vld [vmem:[#allocation2 + $0x670] sm:$0xff]  ;;  %v162_v12 = vld [vmem:[#allocation2 + $0x1d8] sm:$0xff] }
  0xce   :  { %v1097_v41 = vperm.slane %v604_v40, %v1728_v22  ;;  %v379_v42 = vpop.xlane.xlu2 %378  ;;  %v578_v40 = vadd.f32 %v250_v29, %v249_v28  ;;  %v161_v11 = vld [vmem:[#allocation2 + $0x1d0] sm:$0xff]  ;;  %v282_v28 = vld [vmem:[#allocation2 + $0x598] sm:$0xff]  ;;  %v311_v29 = vld [vmem:[#allocation2 + $0x680] sm:$0xff] }
  0xcf   :  { %v601_v43 = vpop.xlane.xlu0 %600  ;;  %v933_v46 = vperm.slane %v379_v42, %v1787_v33 }
  0xd0   :  { %v1096_v47 = vperm.slane %v601_v43, %v1722_v20 }
  0xd1   :  { %v1793_v50 = vsel %vm934_vm5, %v933_v46, %v931_v8  ;;  %v160_v8 = vld [vmem:[#allocation2 + $0x1c8] sm:$0xff] }
  0xd2   :  { %v1098_v51 = vsel %vm914_vm0, %v1097_v41, %v1096_v47  ;;  %531 = vadd.xlane.f32.xlu1 %v530_v44  ;;  %v443_v19 = vadd.f32 %v160_v8, %v159_v7  ;;  %v533_v44 = vadd.f32 %v220_v35, %v219_v34  ;;  %v192_v7 = vld [vmem:[#allocation2 + $0x2c8] sm:$0xff]  ;;  %v221_v8 = vld [vmem:[#allocation2 + $0x3b0] sm:$0xff] }
  0xd3   :  { %576 = vadd.xlane.f32.xlu2 %v575_v48  ;;  %v252_v34 = vld [vmem:[#allocation2 + $0x4a8] sm:$0xff] }
  0xd4   :  { %486 = vadd.xlane.f32.xlu0 %v485_v49  ;;  %v339_v49 = vld [vmem:[#allocation2 + $0x760] sm:$0xff] }
  0xd5   :  { %v472_v59 = vpop.xlane.xlu1 %471 }
  0xd6   :  { %v1012_v60 = vperm.slane %v472_v59, %v1767_v55  ;;  %v517_v61 = vpop.xlane.xlu2 %516 }
  0xd7   :  { %v427_v62 = vpop.xlane.xlu0 %426  ;;  %v1041_v0 = vperm.slane %v517_v61, %v1753_v15 }
  0xd8   :  { %v983_v1 = vperm.slane %v427_v62, %v1787_v33  ;;  %v1800_v4 = vsel %vm930_vm4, %v1012_v60, %v1011_v32  ;;  %v280_v32 = vld [vmem:[#allocation2 + $0x588] sm:$0xff] }
  0xd9   :  { %v1803_v5 = vsel %vm926_vm3, %v1041_v0, %v1040_v30  ;;  %v279_v30 = vld [vmem:[#allocation2 + $0x580] sm:$0xff]  ;;  %v668_v0 = vadd.f32 %v310_v56, %v309_v54  ;;  %v342_v54 = vld [vmem:[#allocation2 + $0x778] sm:$0xff] }
  0xda   :  { %v984_v6 = vsel %vm934_vm5, %v983_v1, %v1775_v9  ;;  %666 = vadd.xlane.f32.xlu1 %v665_v63  ;;  %v623_v43 = vadd.f32 %v280_v32, %v279_v30  ;;  %v398_v63 = vadd.f32 %v130_v53, %v129_v52  ;;  %v312_v30 = vld [vmem:[#allocation2 + $0x688] sm:$0xff]  ;;  %v251_v32 = vld [vmem:[#allocation2 + $0x4a0] sm:$0xff] }
  0xdb   :  { %711 = vadd.xlane.f32.xlu2 %v710_v2  ;;  %v163_v52 = vld [vmem:[#allocation2 + $0x1e0] sm:$0xff]  ;;  %v164_v53 = vld [vmem:[#allocation2 + $0x1e8] sm:$0xff] }
  0xdc   :  { %621 = vadd.xlane.f32.xlu0 %v620_v3 }
  0xdd   :  { %v607_v14 = vpop.xlane.xlu1 %606 }
  0xde   :  { %v1099_v16 = vperm.slane %v607_v14, %v1725_v21  ;;  %v649_v17 = vpop.xlane.xlu2 %648 }
  0xdf   :  { %v562_v18 = vpop.xlane.xlu0 %561  ;;  %v1127_v36 = vperm.slane %v649_v17, %v1722_v20 }
  0xe0   :  { %v1070_v23 = vperm.slane %v562_v18, %v1741_v45  ;;  %v1810_v9 = vsel %vm918_vm1, %v1099_v16, %v1098_v51  ;;  %v340_v51 = vld [vmem:[#allocation2 + $0x768] sm:$0xff] }
  0xe1   :  { %v713_v60 = vadd.f32 %v340_v51, %v339_v49  ;;  %v131_v49 = vld [vmem:[#allocation2 + $0xe0] sm:$0xff]  ;;  %v132_v51 = vld [vmem:[#allocation2 + $0xe8] sm:$0xff] }
  0xe2   :  { %v1071_v26 = vsel %vm922_vm2, %v1070_v23, %v1783_v31  ;;  %444 = vadd.xlane.f32.xlu1 %v443_v19  ;;  %v536_v19 = vadd.f32 %v222_v10, %v221_v8  ;;  %v253_v8 = vld [vmem:[#allocation2 + $0x4b0] sm:$0xff]  ;;  %v254_v10 = vld [vmem:[#allocation2 + $0x4b8] sm:$0xff] }
  0xe3   :  { %489 = vadd.xlane.f32.xlu2 %v488_v24 }
  0xe4   :  { %396 = vadd.xlane.f32.xlu0 %v395_v25  ;;  %v1853_v25 = vadd.s32 4294967232, %v1722_v20 }
  0xe5   :  { %v382_v37 = vpop.xlane.xlu1 %381 }
  0xe6   :  { %v937_v38 = vperm.slane %v382_v37, %v1815_v27  ;;  %v430_v39 = vpop.xlane.xlu2 %429 }
  0xe7   :  { %v652_v31 = vpop.xlane.xlu0 %651  ;;  %v985_v41 = vperm.slane %v430_v39, %v1815_v27 }
  0xe8   :  { %v1128_v42 = vperm.slane %v652_v31, %v1728_v22  ;;  %v1823_v46 = vsel %vm938_vm6, %v937_v38, %v1793_v50 }
  0xe9   :  { %v1826_v47 = vsel %vm938_vm6, %v985_v41, %v984_v6  ;;  %v191_v6 = vld [vmem:[#allocation2 + $0x2c0] sm:$0xff]  ;;  %v671_v41 = vadd.f32 %v312_v30, %v311_v29  ;;  %v314_v29 = vld [vmem:[#allocation2 + $0x698] sm:$0xff] }
  0xea   :  { %v1129_v48 = vsel %vm914_vm0, %v1128_v42, %v1127_v36  ;;  %579 = vadd.xlane.f32.xlu1 %v578_v40  ;;  %v491_v17 = vadd.f32 %v192_v7, %v191_v6  ;;  %v581_v42 = vadd.f32 %v252_v34, %v251_v32  ;;  %v223_v6 = vld [vmem:[#allocation2 + $0x3c0] sm:$0xff]  ;;  %v224_v7 = vld [vmem:[#allocation2 + $0x3c8] sm:$0xff] }
  0xeb   :  { %624 = vadd.xlane.f32.xlu2 %v623_v43  ;;  %v343_v30 = vld [vmem:[#allocation2 + $0x780] sm:$0xff]  ;;  %v344_v32 = vld [vmem:[#allocation2 + $0x788] sm:$0xff] }
  0xec   :  { %534 = vadd.xlane.f32.xlu0 %v533_v44  ;;  %v283_v34 = vld [vmem:[#allocation2 + $0x5a0] sm:$0xff] }
  0xed   :  { %v520_v57 = vpop.xlane.xlu1 %519 }
  0xee   :  { %v1043_v58 = vperm.slane %v520_v57, %v1767_v55  ;;  %v565_v59 = vpop.xlane.xlu2 %564 }
  0xef   :  { %v475_v50 = vpop.xlane.xlu0 %474  ;;  %v1072_v61 = vperm.slane %v565_v59, %v1753_v15  ;;  %v401_v59 = vadd.f32 %v132_v51, %v131_v49  ;;  %v165_v49 = vld [vmem:[#allocation2 + $0x1f0] sm:$0xff]  ;;  %v166_v51 = vld [vmem:[#allocation2 + $0x1f8] sm:$0xff] }
  0xf0   :  { %v1014_v62 = vperm.slane %v475_v50, %v1787_v33  ;;  %v1834_v1 = vsel %vm930_vm4, %v1043_v58, %v1803_v5 }
  0xf1   :  { %v1837_v2 = vsel %vm926_vm3, %v1072_v61, %v1071_v26  ;;  %v281_v26 = vld [vmem:[#allocation2 + $0x590] sm:$0xff] }
  0xf2   :  { %v1841_v3 = vsel %vm934_vm5, %v1014_v62, %v1800_v4  ;;  %714 = vadd.xlane.f32.xlu1 %v713_v60  ;;  %v446_v4 = vadd.f32 %v162_v12, %v161_v11  ;;  %v626_v39 = vadd.f32 %v282_v28, %v281_v26  ;;  %v449_v60 = vadd.f32 %v164_v53, %v163_v52  ;;  %v193_v11 = vld [vmem:[#allocation2 + $0x2d0] sm:$0xff]  ;;  %v194_v12 = vld [vmem:[#allocation2 + $0x2d8] sm:$0xff]  ;;  %v195_v52 = vld [vmem:[#allocation2 + $0x2e0] sm:$0xff] }
  0xf3   :  { %399 = vadd.xlane.f32.xlu2 %v398_v63  ;;  %v1894_v28 = vadd.s32 4294967224, %v1722_v20  ;;  %v196_v53 = vld [vmem:[#allocation2 + $0x2e8] sm:$0xff] }
  0xf4   :  { %669 = vadd.xlane.f32.xlu0 %v668_v0 }
  0xf5   :  { %v655_v13 = vpop.xlane.xlu1 %654 }
  0xf6   :  { %v1130_v5 = vperm.slane %v655_v13, %v1725_v21  ;;  %v697_v14 = vpop.xlane.xlu2 %696 }
  0xf7   :  { %v610_v16 = vpop.xlane.xlu0 %609  ;;  %v1158_v35 = vperm.slane %v697_v14, %v1722_v20 }
  0xf8   :  { %v1101_v18 = vperm.slane %v610_v16, %v1741_v45  ;;  %v1846_v23 = vsel %vm918_vm1, %v1130_v5, %v1129_v48  ;;  %v539_v16 = vadd.f32 %v224_v7, %v223_v6  ;;  %v1921_v6 = vadd.s32 4294967216, %v1722_v20  ;;  %v255_v7 = vld [vmem:[#allocation2 + $0x4c0] sm:$0xff] }
  0xfa   :  { %v1850_v24 = vsel %vm922_vm2, %v1101_v18, %v1810_v9  ;;  %492 = vadd.xlane.f32.xlu1 %v491_v17  ;;  %v494_v18 = vadd.f32 %v194_v12, %v193_v11  ;;  %v286_v11 = vld [vmem:[#allocation2 + $0x5b8] sm:$0xff]  ;;  %v225_v12 = vld [vmem:[#allocation2 + $0x3d0] sm:$0xff] }
  0xfb   :  { %537 = vadd.xlane.f32.xlu2 %v536_v19 }
  0xfc   :  { %447 = vadd.xlane.f32.xlu0 %v446_v4 }
  0xfd   :  { %v385_v36 = vpop.xlane.xlu1 %384 }
  0xfe   :  { %v941_v37 = vperm.slane %v385_v36, %v1853_v25  ;;  %v433_v9 = vpop.xlane.xlu2 %432 }
  0xff   :  { %v700_v38 = vpop.xlane.xlu0 %699  ;;  %v987_v31 = vperm.slane %v433_v9, %v1853_v25 }
 0x100   :  { %v1159_v40 = vperm.slane %v700_v38, %v1728_v22  ;;  %v1861_v43 = vsel %vm942_vm7, %v941_v37, %v1823_v46  ;;  %v341_v22 = vld [vmem:[#allocation2 + $0x770] sm:$0xff] }
 0x101   :  { %v1865_v44 = vsel %vm942_vm7, %v987_v31, %v1826_v47  ;;  %v716_v61 = vadd.f32 %v342_v54, %v341_v22  ;;  %v719_v31 = vadd.f32 %v344_v32, %v343_v30  ;;  %v133_v22 = vld [vmem:[#allocation2 + $0xf0] sm:$0xff]  ;;  %v134_v54 = vld [vmem:[#allocation2 + $0xf8] sm:$0xff] }
 0x102   :  { %v1160_v48 = vsel %vm914_vm0, %v1159_v40, %v1158_v35  ;;  %627 = vadd.xlane.f32.xlu1 %v626_v39  ;;  %v284_v35 = vld [vmem:[#allocation2 + $0x5a8] sm:$0xff]  ;;  %v197_v30 = vld [vmem:[#allocation2 + $0x2f0] sm:$0xff]  ;;  %v198_v32 = vld [vmem:[#allocation2 + $0x2f8] sm:$0xff]  ;;  %vm1191_vm0 = vcmask 1042434  }
 0x103   :  { %672 = vadd.xlane.f32.xlu2 %v671_v41  ;;  %v629_v40 = vadd.f32 %v284_v35, %v283_v34  ;;  %v315_v34 = vld [vmem:[#allocation2 + $0x6a0] sm:$0xff]  ;;  %v316_v35 = vld [vmem:[#allocation2 + $0x6a8] sm:$0xff] }
 0x104   :  { %582 = vadd.xlane.f32.xlu0 %v581_v42 }
 0x105   :  { %v523_v56 = vpop.xlane.xlu1 %522 }
 0x106   :  { %v1045_v57 = vperm.slane %v523_v56, %v1787_v33  ;;  %v568_v46 = vpop.xlane.xlu2 %567 }
 0x107   :  { %v478_v58 = vpop.xlane.xlu0 %477  ;;  %v1074_v47 = vperm.slane %v568_v46, %v1767_v55 }
 0x108   :  { %v1016_v50 = vperm.slane %v478_v58, %v1815_v27  ;;  %v1873_v62 = vsel %vm934_vm5, %v1045_v57, %v1834_v1  ;;  %v452_v58 = vadd.f32 %v166_v51, %v165_v49  ;;  %v257_v49 = vld [vmem:[#allocation2 + $0x4d0] sm:$0xff]  ;;  %v258_v51 = vld [vmem:[#allocation2 + $0x4d8] sm:$0xff] }
 0x109   :  { %v1877_v63 = vsel %vm930_vm4, %v1074_v47, %v1837_v2 }
 0x10a   :  { %v1017_v0 = vsel %vm938_vm6, %v1016_v50, %v1841_v3  ;;  %402 = vadd.xlane.f32.xlu1 %v401_v59  ;;  %v584_v3 = vadd.f32 %v254_v10, %v253_v8  ;;  %v404_v50 = vadd.f32 %v134_v54, %v133_v22  ;;  %v256_v8 = vld [vmem:[#allocation2 + $0x4c8] sm:$0xff]  ;;  %v285_v10 = vld [vmem:[#allocation2 + $0x5b0] sm:$0xff]  ;;  %v227_v22 = vld [vmem:[#allocation2 + $0x3e0] sm:$0xff] }
 0x10b   :  { %450 = vadd.xlane.f32.xlu2 %v449_v60  ;;  %v228_v54 = vld [vmem:[#allocation2 + $0x3e8] sm:$0xff] }
 0x10c   :  { %717 = vadd.xlane.f32.xlu0 %v716_v61 }
 0x10d   :  { %v658_v13 = vpop.xlane.xlu1 %657 }
 0x10e   :  { %v1132_v1 = vperm.slane %v658_v13, %v1741_v45  ;;  %v703_v5 = vpop.xlane.xlu2 %702  ;;  %v226_v13 = vld [vmem:[#allocation2 + $0x3d8] sm:$0xff] }
 0x10f   :  { %v613_v14 = vpop.xlane.xlu0 %612  ;;  %v1161_v2 = vperm.slane %v703_v5, %v1725_v21  ;;  %v313_v21 = vld [vmem:[#allocation2 + $0x690] sm:$0xff] }
 0x110   :  { %v1103_v17 = vperm.slane %v613_v14, %v1753_v15  ;;  %v1886_v19 = vsel %vm922_vm2, %v1132_v1, %v1846_v23  ;;  %v674_v38 = vadd.f32 %v314_v29, %v313_v21  ;;  %v345_v21 = vld [vmem:[#allocation2 + $0x790] sm:$0xff]  ;;  %v346_v29 = vld [vmem:[#allocation2 + $0x798] sm:$0xff] }
 0x111   :  { %v1889_v4 = vsel %vm918_vm1, %v1161_v2, %v1160_v48  ;;  %vm1193_vm1 = vcmask 1043459  }
 0x112   :  { %v1104_v26 = vsel %vm926_vm3, %v1103_v17, %v1850_v24  ;;  %540 = vadd.xlane.f32.xlu1 %v539_v16  ;;  %v587_v16 = vadd.f32 %v256_v8, %v255_v7  ;;  %v632_v17 = vadd.f32 %v286_v11, %v285_v10  ;;  %v1960_v7 = vadd.s32 4294967208, %v1722_v20  ;;  %v347_v8 = vld [vmem:[#allocation2 + $0x7a0] sm:$0xff]  ;;  %v348_v10 = vld [vmem:[#allocation2 + $0x7a8] sm:$0xff]  ;;  %v229_v11 = vld [vmem:[#allocation2 + $0x3f0] sm:$0xff] }
 0x113   :  { %585 = vadd.xlane.f32.xlu2 %v584_v3  ;;  %v542_v3 = vadd.f32 %v226_v13, %v225_v12  ;;  %v230_v12 = vld [vmem:[#allocation2 + $0x3f8] sm:$0xff]  ;;  %v317_v13 = vld [vmem:[#allocation2 + $0x6b0] sm:$0xff] }
 0x114   :  { %495 = vadd.xlane.f32.xlu0 %v494_v18 }
 0x115   :  { %v436_v23 = vpop.xlane.xlu1 %435 }
 0x116   :  { %v989_v36 = vperm.slane %v436_v23, %v1894_v28  ;;  %v481_v37 = vpop.xlane.xlu2 %480 }
 0x117   :  { %v388_v9 = vpop.xlane.xlu0 %387  ;;  %v1018_v24 = vperm.slane %v481_v37, %v1853_v25 }
 0x118   :  { %v945_v39 = vperm.slane %v388_v9, %v1894_v28  ;;  %v1901_v41 = vsel %vm946_vm8, %v989_v36, %v1865_v44  ;;  %v722_v9 = vadd.f32 %v346_v29, %v345_v21  ;;  %v289_v29 = vld [vmem:[#allocation2 + $0x5d0] sm:$0xff] }
 0x119   :  { %v1904_v42 = vsel %vm942_vm7, %v1018_v24, %v1017_v0 }
 0x11a   :  { %v947_v48 = vsel %vm946_vm8, %v945_v39, %v1861_v43  ;;  %675 = vadd.xlane.f32.xlu1 %v674_v38  ;;  %v497_v43 = vadd.f32 %v196_v53, %v195_v52  ;;  %v677_v39 = vadd.f32 %v316_v35, %v315_v34  ;;  %v287_v52 = vld [vmem:[#allocation2 + $0x5c0] sm:$0xff]  ;;  %v288_v53 = vld [vmem:[#allocation2 + $0x5c8] sm:$0xff] }
 0x11b   :  { %720 = vadd.xlane.f32.xlu2 %v719_v31  ;;  %v320_v34 = vld [vmem:[#allocation2 + $0x6c8] sm:$0xff] }
 0x11c   :  { %630 = vadd.xlane.f32.xlu0 %v629_v40  ;;  %v260_v35 = vld [vmem:[#allocation2 + $0x4e8] sm:$0xff] }
 0x11d   :  { %v571_v56 = vpop.xlane.xlu1 %570 }
 0x11e   :  { %v1076_v57 = vperm.slane %v571_v56, %v1787_v33  ;;  %v616_v44 = vpop.xlane.xlu2 %615 }
 0x11f   :  { %v526_v46 = vpop.xlane.xlu0 %525  ;;  %v1105_v59 = vperm.slane %v616_v44, %v1767_v55 }
 0x120   :  { %v1047_v47 = vperm.slane %v526_v46, %v1815_v27  ;;  %v1913_v60 = vsel %vm934_vm5, %v1076_v57, %v1877_v63  ;;  %v590_v46 = vadd.f32 %v258_v51, %v257_v49  ;;  %v261_v49 = vld [vmem:[#allocation2 + $0x4f0] sm:$0xff]  ;;  %v262_v51 = vld [vmem:[#allocation2 + $0x4f8] sm:$0xff] }
 0x121   :  { %v1916_v61 = vsel %vm930_vm4, %v1105_v59, %v1104_v26 }
 0x122   :  { %v1048_v0 = vsel %vm938_vm6, %v1047_v47, %v1873_v62  ;;  %453 = vadd.xlane.f32.xlu1 %v452_v58  ;;  %v545_v47 = vadd.f32 %v228_v54, %v227_v22  ;;  %v349_v22 = vld [vmem:[#allocation2 + $0x7b0] sm:$0xff]  ;;  %v350_v54 = vld [vmem:[#allocation2 + $0x7b8] sm:$0xff] }
 0x123   :  { %498 = vadd.xlane.f32.xlu2 %v497_v43 }
 0x124   :  { %405 = vadd.xlane.f32.xlu0 %v404_v50 }
 0x125   :  { %v706_v63 = vpop.xlane.xlu1 %705 }
 0x126   :  { %v1163_v1 = vperm.slane %v706_v63, %v1741_v45  ;;  %v391_v5 = vpop.xlane.xlu2 %390  ;;  %v318_v63 = vld [vmem:[#allocation2 + $0x6b8] sm:$0xff] }
 0x127   :  { %v661_v14 = vpop.xlane.xlu0 %660  ;;  %v949_v62 = vperm.slane %v391_v5, %v1921_v6 }
 0x128   :  { %v1134_v2 = vperm.slane %v661_v14, %v1753_v15  ;;  %v1928_v18 = vsel %vm922_vm2, %v1163_v1, %v1889_v4  ;;  %vm1195_vm2 = vcmask 1044484  }
 0x129   :  { %v1931_v26 = vsel %vm950_vm9, %v949_v62, %v947_v48 }
 0x12a   :  { %v1135_v45 = vsel %vm926_vm3, %v1134_v2, %v1886_v19  ;;  %588 = vadd.xlane.f32.xlu1 %v587_v16  ;;  %v500_v19 = vadd.f32 %v198_v32, %v197_v30  ;;  %v725_v16 = vadd.f32 %v348_v10, %v347_v8  ;;  %v548_v2 = vadd.f32 %v230_v12, %v229_v11  ;;  %v290_v30 = vld [vmem:[#allocation2 + $0x5d8] sm:$0xff]  ;;  %v319_v32 = vld [vmem:[#allocation2 + $0x6c0] sm:$0xff]  ;;  %v352_v10 = vld [vmem:[#allocation2 + $0x7c8] sm:$0xff] }
 0x12b   :  { %633 = vadd.xlane.f32.xlu2 %v632_v17  ;;  %v680_v17 = vadd.f32 %v318_v63, %v317_v13  ;;  %v1999_v8 = vadd.s32 4294967200, %v1722_v20  ;;  %v293_v11 = vld [vmem:[#allocation2 + $0x5f0] sm:$0xff]  ;;  %v294_v12 = vld [vmem:[#allocation2 + $0x5f8] sm:$0xff] }
 0x12c   :  { %543 = vadd.xlane.f32.xlu0 %v542_v3  ;;  %v321_v13 = vld [vmem:[#allocation2 + $0x6d0] sm:$0xff]  ;;  %v322_v63 = vld [vmem:[#allocation2 + $0x6d8] sm:$0xff] }
 0x12d   :  { %v484_v23 = vpop.xlane.xlu1 %483 }
 0x12e   :  { %v1020_v36 = vperm.slane %v484_v23, %v1894_v28  ;;  %v529_v4 = vpop.xlane.xlu2 %528 }
 0x12f   :  { %v439_v37 = vpop.xlane.xlu0 %438  ;;  %v1049_v38 = vperm.slane %v529_v4, %v1853_v25 }
 0x130   :  { %v991_v24 = vperm.slane %v439_v37, %v1921_v6  ;;  %v1940_v31 = vsel %vm946_vm8, %v1020_v36, %v1904_v42  ;;  %v638_v37 = vadd.f32 %v290_v30, %v289_v29  ;;  %v353_v29 = vld [vmem:[#allocation2 + $0x7d0] sm:$0xff]  ;;  %v354_v30 = vld [vmem:[#allocation2 + $0x7d8] sm:$0xff] }
 0x131   :  { %v1943_v40 = vsel %vm942_vm7, %v1049_v38, %v1048_v0 }
 0x132   :  { %v992_v48 = vsel %vm950_vm9, %v991_v24, %v1901_v41  ;;  %723 = vadd.xlane.f32.xlu1 %v722_v9  ;;  %v635_v41 = vadd.f32 %v288_v53, %v287_v52  ;;  %v291_v52 = vld [vmem:[#allocation2 + $0x5e0] sm:$0xff]  ;;  %v292_v53 = vld [vmem:[#allocation2 + $0x5e8] sm:$0xff] }
 0x133   :  { %501 = vadd.xlane.f32.xlu2 %v500_v19 }
 0x134   :  { %678 = vadd.xlane.f32.xlu0 %v677_v39 }
 0x135   :  { %v619_v56 = vpop.xlane.xlu1 %618 }
 0x136   :  { %v1107_v57 = vperm.slane %v619_v56, %v1787_v33  ;;  %v664_v42 = vpop.xlane.xlu2 %663 }
 0x137   :  { %v574_v44 = vpop.xlane.xlu0 %573  ;;  %v1136_v58 = vperm.slane %v664_v42, %v1767_v55 }
 0x138   :  { %v1078_v59 = vperm.slane %v574_v44, %v1815_v27  ;;  %v1952_v43 = vsel %vm934_vm5, %v1107_v57, %v1916_v61  ;;  %v596_v44 = vadd.f32 %v262_v51, %v261_v49  ;;  %v2018_v49 = vadd.s32 4294967192, %v1722_v20  ;;  %v357_v51 = vld [vmem:[#allocation2 + $0x7f0] sm:$0xff] }
 0x139   :  { %v1955_v50 = vsel %vm930_vm4, %v1136_v58, %v1135_v45 }
 0x13a   :  { %v1079_v0 = vsel %vm938_vm6, %v1078_v59, %v1913_v60  ;;  %591 = vadd.xlane.f32.xlu1 %v590_v46  ;;  %v728_v59 = vadd.f32 %v350_v54, %v349_v22  ;;  %v356_v22 = vld [vmem:[#allocation2 + $0x7e8] sm:$0xff] }
 0x13b   :  { %636 = vadd.xlane.f32.xlu2 %v635_v41 }
 0x13c   :  { %546 = vadd.xlane.f32.xlu0 %v545_v47 }
 0x13d   :  { %v394_v61 = vpop.xlane.xlu1 %393 }
 0x13e   :  { %v953_v1 = vperm.slane %v394_v61, %v1960_v7  ;;  %v442_v5 = vpop.xlane.xlu2 %441 }
 0x13f   :  { %v709_v14 = vpop.xlane.xlu0 %708  ;;  %v993_v60 = vperm.slane %v442_v5, %v1960_v7 }
 0x140   :  { %v1165_v62 = vperm.slane %v709_v14, %v1753_v15  ;;  %v1967_v3 = vsel %vm954_vm10, %v953_v1, %v1931_v26  ;;  %v259_v15 = vld [vmem:[#allocation2 + $0x4e0] sm:$0xff] }
 0x141   :  { %v1970_v45 = vsel %vm954_vm10, %v993_v60, %v992_v48  ;;  %v593_v24 = vadd.f32 %v260_v35, %v259_v15  ;;  %v644_v60 = vadd.f32 %v294_v12, %v293_v11  ;;  %v325_v15 = vld [vmem:[#allocation2 + $0x6f0] sm:$0xff]  ;;  %v326_v35 = vld [vmem:[#allocation2 + $0x6f8] sm:$0xff] }
 0x142   :  { %v1166_v21 = vsel %vm926_vm3, %v1165_v62, %v1928_v18  ;;  %726 = vadd.xlane.f32.xlu1 %v725_v16  ;;  %v683_v18 = vadd.f32 %v320_v34, %v319_v32  ;;  %v686_v62 = vadd.f32 %v322_v63, %v321_v13  ;;  %v323_v32 = vld [vmem:[#allocation2 + $0x6e0] sm:$0xff]  ;;  %v324_v34 = vld [vmem:[#allocation2 + $0x6e8] sm:$0xff]  ;;  %vm1197_vm3 = vcmask 1045509  }
 0x143   :  { %549 = vadd.xlane.f32.xlu2 %v548_v2 }
 0x144   :  { %681 = vadd.xlane.f32.xlu0 %v680_v17 }
 0x145   :  { %v532_v23 = vpop.xlane.xlu1 %531 }
 0x146   :  { %v1051_v36 = vperm.slane %v532_v23, %v1894_v28  ;;  %v577_v26 = vpop.xlane.xlu2 %576 }
 0x147   :  { %v487_v4 = vpop.xlane.xlu0 %486  ;;  %v1080_v9 = vperm.slane %v577_v26, %v1853_v25 }
 0x148   :  { %v1022_v38 = vperm.slane %v487_v4, %v1921_v6  ;;  %v1979_v19 = vsel %vm946_vm8, %v1051_v36, %v1943_v40 }
 0x149   :  { %v1982_v39 = vsel %vm942_vm7, %v1080_v9, %v1079_v0 }
 0x14a   :  { %v1023_v48 = vsel %vm950_vm9, %v1022_v38, %v1940_v31  ;;  %639 = vadd.xlane.f32.xlu1 %v638_v37  ;;  %v641_v31 = vadd.f32 %v292_v53, %v291_v52  ;;  %v692_v38 = vadd.f32 %v326_v35, %v325_v15  ;;  %v358_v52 = vld [vmem:[#allocation2 + $0x7f8] sm:$0xff]  ;;  %v355_v53 = vld [vmem:[#allocation2 + $0x7e0] sm:$0xff] }
 0x14b   :  { %684 = vadd.xlane.f32.xlu2 %v683_v18 }
 0x14c   :  { %594 = vadd.xlane.f32.xlu0 %v593_v24 }
 0x14d   :  { %v667_v56 = vpop.xlane.xlu1 %666 }
 0x14e   :  { %v1138_v57 = vperm.slane %v667_v56, %v1787_v33  ;;  %v712_v40 = vpop.xlane.xlu2 %711 }
 0x14f   :  { %v622_v42 = vpop.xlane.xlu0 %621  ;;  %v1167_v46 = vperm.slane %v712_v40, %v1767_v55  ;;  %v351_v55 = vld [vmem:[#allocation2 + $0x7c0] sm:$0xff]  ;;  %v740_v40 = vadd.f32 %v358_v52, %v357_v51 }
 0x150   :  { %v1109_v58 = vperm.slane %v622_v42, %v1815_v27  ;;  %v1991_v41 = vsel %vm934_vm5, %v1138_v57, %v1955_v50  ;;  %v731_v14 = vadd.f32 %v352_v10, %v351_v55 }
 0x151   :  { %v1994_v47 = vsel %vm930_vm4, %v1167_v46, %v1166_v21  ;;  %vm1199_vm4 = vcmask 1046534  }
 0x152   :  { %v1110_v0 = vsel %vm938_vm6, %v1109_v58, %v1952_v43  ;;  %597 = vadd.xlane.f32.xlu1 %v596_v44  ;;  %v737_v44 = vadd.f32 %v356_v22, %v355_v53 }
 0x153   :  { %642 = vadd.xlane.f32.xlu2 %v641_v31 }
 0x154   :  { %729 = vadd.xlane.f32.xlu0 %v728_v59 }
 0x155   :  { %v445_v50 = vpop.xlane.xlu1 %444 }
 0x156   :  { %v995_v61 = vperm.slane %v445_v50, %v1999_v8  ;;  %v490_v1 = vpop.xlane.xlu2 %489 }
 0x157   :  { %v397_v5 = vpop.xlane.xlu0 %396  ;;  %v1024_v43 = vperm.slane %v490_v1, %v1960_v7 }
 0x158   :  { %v957_v16 = vperm.slane %v397_v5, %v1999_v8  ;;  %v996_v2 = vsel %vm958_vm11, %v995_v61, %v1970_v45  ;;  %v734_v45 = vadd.f32 %v354_v30, %v353_v29 }
 0x159   :  { %v1025_v17 = vsel %vm954_vm10, %v1024_v43, %v1023_v48 }
 0x15a   :  { %v959_v21 = vsel %vm958_vm11, %v957_v16, %v1967_v3  ;;  %732 = vadd.xlane.f32.xlu1 %v731_v14  ;;  %v689_v3 = vadd.f32 %v324_v34, %v323_v32 }
 0x15b   :  { %645 = vadd.xlane.f32.xlu2 %v644_v60  ;;  %v2041_v60 = vadd.s32 4294967184, %v1722_v20 }
 0x15c   :  { %687 = vadd.xlane.f32.xlu0 %v686_v62 }
 0x15d   :  { %v580_v23 = vpop.xlane.xlu1 %579 }
 0x15e   :  { %v1082_v36 = vperm.slane %v580_v23, %v1894_v28  ;;  %v625_v26 = vpop.xlane.xlu2 %624 }
 0x15f   :  { %v535_v4 = vpop.xlane.xlu0 %534  ;;  %v1111_v37 = vperm.slane %v625_v26, %v1853_v25 }
 0x160   :  { %v1053_v9 = vperm.slane %v535_v4, %v1921_v6  ;;  %v1083_v18 = vsel %vm946_vm8, %v1082_v36, %v1982_v39 }
 0x161   :  { %v1112_v24 = vsel %vm942_vm7, %v1111_v37, %v1110_v0 }
 0x162   :  { %v1054_v48 = vsel %vm950_vm9, %v1053_v9, %v1979_v19  ;;  %735 = vadd.xlane.f32.xlu1 %v734_v45 }
 0x163   :  { %693 = vadd.xlane.f32.xlu2 %v692_v38 }
 0x164   :  { %690 = vadd.xlane.f32.xlu0 %v689_v3 }
 0x165   :  { %v715_v54 = vpop.xlane.xlu1 %714 }
 0x166   :  { %v1169_v56 = vperm.slane %v715_v54, %v1787_v33  ;;  %v400_v39 = vpop.xlane.xlu2 %399  ;;  %v2072_v54 = vadd.s32 4294967176, %v1722_v20 }
 0x167   :  { %v670_v57 = vpop.xlane.xlu0 %669  ;;  %v961_v42 = vperm.slane %v400_v39, %v2018_v49 }
 0x168   :  { %v1140_v19 = vperm.slane %v670_v57, %v1815_v27  ;;  %v1170_v46 = vsel %vm934_vm5, %v1169_v56, %v1994_v47  ;;  %vm1201_vm5 = vcmask 1047559  }
 0x169   :  { %v963_v58 = vsel %vm962_vm12, %v961_v42, %v959_v21 }
 0x16a   :  { %v1141_v31 = vsel %vm938_vm6, %v1140_v19, %v1991_v41  ;;  %741 = vadd.xlane.f32.xlu1 %v740_v40 }
 0x16c   :  { %738 = vadd.xlane.f32.xlu0 %v737_v44 }
 0x16d   :  { %v493_v33 = vpop.xlane.xlu1 %492 }
 0x16e   :  { %v1026_v59 = vperm.slane %v493_v33, %v1999_v8  ;;  %v538_v0 = vpop.xlane.xlu2 %537  ;;  %v774_v33 = vld [vmem:[#allocation5 + $0xf8] sm:$0xff] }
 0x16f   :  { %v448_v55 = vpop.xlane.xlu0 %447  ;;  %v1055_v10 = vperm.slane %v538_v0, %v1960_v7  ;;  %1224 = vmatpush.msra.mxu1 %v774_v33  ;;  %v745_v33 = vld [vmem:[#allocation5 + $0x10] sm:$0xff] }
 0x170   :  { %v997_v11 = vperm.slane %v448_v55, %v2018_v49  ;;  %v1027_v12 = vsel %vm958_vm11, %v1026_v59, %v1025_v17 }
 0x171   :  { %v1056_v47 = vsel %vm954_vm10, %v1055_v10, %v1054_v48 }
 0x172   :  { %v998_v13 = vsel %vm962_vm12, %v997_v11, %v996_v2  ;;  %v771_v11 = vld [vmem:[#allocation5 + $0xe0] sm:$0xff] }
 0x175   :  { %v628_v63 = vpop.xlane.xlu1 %627 }
 0x176   :  { %v1113_v41 = vperm.slane %v628_v63, %v1894_v28  ;;  %v673_v50 = vpop.xlane.xlu2 %672  ;;  %v769_v63 = vld [vmem:[#allocation5 + $0xd0] sm:$0xff] }
 0x177   :  { %v583_v61 = vpop.xlane.xlu0 %582  ;;  %v1142_v1 = vperm.slane %v673_v50, %v1853_v25 }
 0x178   :  { %v1084_v5 = vperm.slane %v583_v61, %v1921_v6  ;;  %v1114_v14 = vsel %vm946_vm8, %v1113_v41, %v1112_v24  ;;  %v770_v41 = vld [vmem:[#allocation5 + $0xd8] sm:$0xff]  ;;  %v767_v61 = vld [vmem:[#allocation5 + $0xc0] sm:$0xff] }
 0x179   :  { %v1143_v43 = vsel %vm942_vm7, %v1142_v1, %v1141_v31  ;;  %v773_v31 = vld [vmem:[#allocation5 + $0xf0] sm:$0xff]  ;;  %v768_v1 = vld [vmem:[#allocation5 + $0xc8] sm:$0xff] }
 0x17a   :  { %v1085_v16 = vsel %vm950_vm9, %v1084_v5, %v1083_v18  ;;  %1204 = vmatpush.msra.mxu0 %v773_v31  ;;  %v748_v31 = vld [vmem:[#allocation5 + $0x28] sm:$0xff] }
 0x17c   :  { %1205 = vmatpush.msra.mxu0 %v771_v11  ;;  %v744_v11 = vld [vmem:[#allocation5 + $0x8] sm:$0xff] }
 0x17d   :  { %v403_v62 = vpop.xlane.xlu1 %402 }
 0x17e   :  { %v965_v2 = vperm.slane %v403_v62, %v2041_v60  ;;  %v451_v17 = vpop.xlane.xlu2 %450  ;;  %1206 = vmatpush.msra.mxu0 %v769_v63  ;;  %v1276_v63 = vld [vmem:[#allocation8 + $0xf0] sm:$0xff] }
 0x17f   :  { %v718_v21 = vpop.xlane.xlu0 %717  ;;  %v999_v29 = vperm.slane %v451_v17, %v2041_v60  ;;  %v763_v17 = vld [vmem:[#allocation5 + $0xa0] sm:$0xff]  ;;  %1316 = vmatpush.msra.mxu2 %v1276_v63 }
 0x180   :  { %v1171_v30 = vperm.slane %v718_v21, %v1815_v27  ;;  %v967_v32 = vsel %vm966_vm13, %v965_v2, %v963_v58  ;;  %1207 = vmatpush.msra.mxu0 %v767_v61  ;;  %v764_v21 = vld [vmem:[#allocation5 + $0xa8] sm:$0xff] }
 0x181   :  { %v1000_v34 = vsel %vm966_vm13, %v999_v29, %v998_v13  ;;  %v761_v29 = vld [vmem:[#allocation5 + $0x90] sm:$0xff]  ;;  %v1294_v63 = vld [vmem:[#allocation8 + $0x180] sm:$0xff] }
 0x182   :  { %v1172_v15 = vsel %vm938_vm6, %v1171_v30, %v1170_v46  ;;  %v762_v30 = vld [vmem:[#allocation5 + $0x98] sm:$0xff] }
 0x185   :  { %v541_v35 = vpop.xlane.xlu1 %540 }
 0x186   :  { %v1057_v23 = vperm.slane %v541_v35, %v1999_v8  ;;  %v586_v36 = vpop.xlane.xlu2 %585  ;;  %v758_v35 = vld [vmem:[#allocation5 + $0x78] sm:$0xff] }
 0x187   :  { %v496_v26 = vpop.xlane.xlu0 %495  ;;  %v1086_v4 = vperm.slane %v586_v36, %v1960_v7 }
 0x188   :  { %v1028_v45 = vperm.slane %v496_v26, %v2018_v49  ;;  %v2053_v37 = vsel %vm958_vm11, %v1057_v23, %v1056_v47 }
 0x189   :  { %v2056_v27 = vsel %vm954_vm10, %v1086_v4, %v1085_v16 }
 0x18a   :  { %v1029_v9 = vsel %vm962_vm12, %v1028_v45, %v1027_v12  ;;  %v772_v12 = vld [vmem:[#allocation5 + $0xe8] sm:$0xff] }
 0x18b   :  { %1225 = vmatpush.msra.mxu1 %v772_v12 }
 0x18d   :  { %v676_v3 = vpop.xlane.xlu1 %675  ;;  %1226 = vmatpush.msra.mxu1 %v770_v41  ;;  %v1308_v41 = vld [vmem:[#allocation8 + $0x1f0] sm:$0xff] }
 0x18e   :  { %v1144_v38 = vperm.slane %v676_v3, %v1894_v28  ;;  %v721_v18 = vpop.xlane.xlu2 %720  ;;  %v756_v3 = vld [vmem:[#allocation5 + $0x68] sm:$0xff]  ;;  %1336 = vmatpush.msra.mxu3 %v1308_v41 }
 0x18f   :  { %v631_v24 = vpop.xlane.xlu0 %630  ;;  %v1173_v48 = vperm.slane %v721_v18, %v1853_v25  ;;  %1227 = vmatpush.msra.mxu1 %v768_v1 }
 0x190   :  { %v1115_v51 = vperm.slane %v631_v24, %v1921_v6  ;;  %v2063_v52 = vsel %vm946_vm8, %v1144_v38, %v1143_v43  ;;  %v766_v43 = vld [vmem:[#allocation5 + $0xb8] sm:$0xff] }
 0x191   :  { %v2066_v53 = vsel %vm942_vm7, %v1173_v48, %v1172_v15  ;;  %1228 = vmatpush.msra.mxu1 %v766_v43  ;;  %v757_v15 = vld [vmem:[#allocation5 + $0x70] sm:$0xff] }
 0x192   :  { %v2069_v22 = vsel %vm950_vm9, %v1115_v51, %v1114_v14  ;;  %v765_v14 = vld [vmem:[#allocation5 + $0xb0] sm:$0xff]  ;;  %v754_v51 = vld [vmem:[#allocation5 + $0x58] sm:$0xff] }
 0x193   :  { %1208 = vmatpush.msra.mxu0 %v765_v14  ;;  %1229 = vmatpush.msra.mxu1 %v764_v21  ;;  %v753_v48 = vld [vmem:[#allocation5 + $0x50] sm:$0xff]  ;;  %v1306_v14 = vld [vmem:[#allocation8 + $0x1e0] sm:$0xff] }
 0x194   :  { %v1275_v21 = vld [vmem:[#allocation8 + $0xe8] sm:$0xff]  ;;  %1337 = vmatpush.msra.mxu3 %v1306_v14  ;;  %v1260_v14 = vld [vmem:[#allocation8 + $0x70] sm:$0xff] }
 0x195   :  { %v454_v56 = vpop.xlane.xlu1 %453  ;;  %1209 = vmatpush.msra.mxu0 %v763_v17  ;;  %1230 = vmatpush.msra.mxu1 %v762_v30  ;;  %v1272_v30 = vld [vmem:[#allocation8 + $0xd0] sm:$0xff] }
 0x196   :  { %v1001_v39 = vperm.slane %v454_v56, %v2072_v54  ;;  %v499_v57 = vpop.xlane.xlu2 %498 }
 0x197   :  { %v406_v25 = vpop.xlane.xlu0 %405  ;;  %v1030_v59 = vperm.slane %v499_v57, %v2041_v60  ;;  %1210 = vmatpush.msra.mxu0 %v761_v29  ;;  %v752_v57 = vld [vmem:[#allocation5 + $0x48] sm:$0xff] }
 0x198   :  { %v969_v40 = vperm.slane %v406_v25, %v2072_v54  ;;  %v1002_v42 = vsel %vm970_vm14, %v1001_v39, %v1000_v34  ;;  %v760_v34 = vld [vmem:[#allocation5 + $0x88] sm:$0xff]  ;;  %v751_v39 = vld [vmem:[#allocation5 + $0x40] sm:$0xff] }
 0x199   :  { %v1031_v13 = vsel %vm966_vm13, %v1030_v59, %v1029_v9  ;;  %1231 = vmatpush.msra.mxu1 %v760_v34  ;;  %v755_v9 = vld [vmem:[#allocation5 + $0x60] sm:$0xff]  ;;  %v746_v59 = vld [vmem:[#allocation5 + $0x18] sm:$0xff]  ;;  %v1307_v29 = vld [vmem:[#allocation8 + $0x1e8] sm:$0xff] }
 0x19a   :  { %v971_v19 = vsel %vm970_vm14, %v969_v40, %v967_v32  ;;  %v759_v32 = vld [vmem:[#allocation5 + $0x80] sm:$0xff]  ;;  %v749_v40 = vld [vmem:[#allocation5 + $0x30] sm:$0xff] }
 0x19b   :  { %v1190_v44 = vsel %vm1189_vm15, %v1002_v42, %v971_v19  ;;  %1211 = vmatpush.msra.mxu0 %v759_v32  ;;  %1232 = vmatpush.msra.mxu1 %v758_v35  ;;  %v750_v42 = vld [vmem:[#allocation5 + $0x38] sm:$0xff] }
 0x19c   :  { %v1304_v32 = vld [vmem:[#allocation8 + $0x1d0] sm:$0xff]  ;;  %v1273_v34 = vld [vmem:[#allocation8 + $0xd8] sm:$0xff] }
 0x19d   :  { %v2078_v46 = vpop.xlane.xlu1 %588  ;;  %1212 = vmatpush.msra.mxu0 %v757_v15  ;;  %1233 = vmatpush.msra.mxu1 %v756_v3  ;;  %v1305_v15 = vld [vmem:[#allocation8 + $0x1d8] sm:$0xff]  ;;  %v1271_v3 = vld [vmem:[#allocation8 + $0xc8] sm:$0xff] }
 0x19e   :  { %v2080_v58 = vpop.xlane.xlu2 %633  ;;  %v1088_v12 = vperm.slane %v2078_v46, %v1999_v8  ;;  %v1274_v46 = vld [vmem:[#allocation8 + $0xe0] sm:$0xff]  ;;  %1338 = vmatpush.msra.mxu3 %v1304_v32  ;;  %v1259_v32 = vld [vmem:[#allocation8 + $0x68] sm:$0xff] }
 0x19f   :  { %v544_v20 = vpop.xlane.xlu0 %543  ;;  %1213 = vmatpush.msra.mxu0 %v755_v9  ;;  %1234 = vmatpush.msra.mxu1 %v754_v51 }
 0x1a0   :  { %v1059_v23 = vperm.slane %v544_v20, %v2018_v49  ;;  %v747_v20 = vld [vmem:[#allocation5 + $0x20] sm:$0xff]  ;;  %v1089_v61 = vsel %vm958_vm11, %v1088_v12, %v2056_v27  ;;  %1317 = vmatpush.msra.mxu2 %v1274_v46 }
 0x1a1   :  { %1214 = vmatpush.msra.mxu0 %v753_v48  ;;  %1235 = vmatpush.msra.mxu1 %v752_v57  ;;  %v1300_v48 = vld [vmem:[#allocation8 + $0x1b0] sm:$0xff]  ;;  %v1266_v57 = vld [vmem:[#allocation8 + $0xa0] sm:$0xff]  ;;  %v1297_v12 = vld [vmem:[#allocation8 + $0x198] sm:$0xff] }
 0x1a2   :  { %v1060_v38 = vsel %vm962_vm12, %v1059_v23, %v2053_v37  ;;  %v1270_v23 = vld [vmem:[#allocation8 + $0xc0] sm:$0xff]  ;;  %1318 = vmatpush.msra.mxu2 %v1272_v30 }
 0x1a3   :  { %1215 = vmatpush.msra.mxu0 %v751_v39  ;;  %1236 = vmatpush.msra.mxu1 %v750_v42  ;;  %v1267_v42 = vld [vmem:[#allocation8 + $0xa8] sm:$0xff]  ;;  %v1290_v30 = vld [vmem:[#allocation8 + $0x160] sm:$0xff] }
 0x1a4   :  { %1319 = vmatpush.msra.mxu2 %v1270_v23  ;;  %v1256_v23 = vld [vmem:[#allocation8 + $0x50] sm:$0xff] }
 0x1a5   :  { %v2083_v0 = vpop.xlane.xlu1 %723  ;;  %1216 = vmatpush.msra.mxu0 %v749_v40  ;;  %1237 = vmatpush.msra.mxu1 %v748_v31 }
 0x1a6   :  { %v502_v55 = vpop.xlane.xlu2 %501 }
 0x1a7   :  { %v2085_v10 = vpop.xlane.xlu0 %678  ;;  %v1032_v47 = vperm.slane %v502_v55, %v2072_v54  ;;  %1217 = vmatpush.msra.mxu0 %v747_v20  ;;  %v743_v55 = vld [vmem:[#allocation5] sm:$0xff]  ;;  %1238 = vmatpush.msra.mxu1 %v746_v59  ;;  %v1296_v59 = vld [vmem:[#allocation8 + $0x190] sm:$0xff] }
 0x1a8   :  { %v1146_v41 = vperm.slane %v2085_v10, %v1921_v6  ;;  %v1261_v10 = vld [vmem:[#allocation8 + $0x78] sm:$0xff] }
 0x1a9   :  { %v1033_v50 = vsel %vm970_vm14, %v1032_v47, %v1031_v13  ;;  %1218 = vmatpush.msra.mxu0 %v745_v33  ;;  %1239 = vmatpush.msra.mxu1 %v744_v11  ;;  %v1264_v33 = vld [vmem:[#allocation8 + $0x90] sm:$0xff] }
 0x1aa   :  { %v1192_v5 = vsel %vm1191_vm0, %v1033_v50, %v1190_v44  ;;  %v1277_v50 = vld [vmem:[#allocation8 + $0xf8] sm:$0xff] }
 0x1ab   :  { %1219 = vmatpush.msra.mxu0 %v743_v55 }
 0x1ad   :  { %v2090_v16 = vpop.xlane.xlu1 %591  ;;  %1356 = vmatpush.msrb.mxu0 %v1277_v50 }
 0x1ae   :  { %v2092_v62 = vpop.xlane.xlu2 %636  ;;  %v1090_v47 = vperm.slane %v2090_v16, %v2018_v49 }
 0x1af   :  { %v547_v2 = vpop.xlane.xlu0 %546  ;;  %1357 = vmatpush.msrb.mxu0 %v1275_v21 }
 0x1b0   :  { %v1061_v36 = vperm.slane %v547_v2, %v2041_v60  ;;  %v1091_v43 = vsel %vm962_vm12, %v1090_v47, %v1089_v61  ;;  %v1263_v61 = vld [vmem:[#allocation8 + $0x88] sm:$0xff] }
 0x1b1   :  { %1358 = vmatpush.msrb.mxu0 %v1273_v34  ;;  %v1291_v34 = vld [vmem:[#allocation8 + $0x168] sm:$0xff] }
 0x1b2   :  { %v1062_v24 = vsel %vm966_vm13, %v1061_v36, %v1060_v38  ;;  %v1302_v36 = vld [vmem:[#allocation8 + $0x1c0] sm:$0xff]  ;;  %v1303_v38 = vld [vmem:[#allocation8 + $0x1c8] sm:$0xff] }
 0x1b3   :  { %1339 = vmatpush.msra.mxu3 %v1302_v36  ;;  %1359 = vmatpush.msrb.mxu0 %v1271_v3  ;;  %v1288_v36 = vld [vmem:[#allocation8 + $0x150] sm:$0xff] }
 0x1b5   :  { %v2096_v26 = vpop.xlane.xlu1 %726  ;;  %1340 = vmatpush.msra.mxu3 %v1300_v48  ;;  %v1254_v48 = vld [vmem:[#allocation8 + $0x40] sm:$0xff] }
 0x1b6   :  { %v550_v4 = vpop.xlane.xlu2 %549 }
 0x1b7   :  { %v2098_v45 = vpop.xlane.xlu0 %681  ;;  %v1063_v18 = vperm.slane %v550_v4, %v2072_v54  ;;  %v1117_v4 = vperm.slane %v2080_v58, %v1960_v7  ;;  %v1301_v58 = vld [vmem:[#allocation8 + $0x1b8] sm:$0xff] }
 0x1b9   :  { %v1064_v56 = vsel %vm970_vm14, %v1063_v18, %v1062_v24  ;;  %v1119_v18 = vperm.slane %v2092_v62, %v1999_v8  ;;  %v1268_v24 = vld [vmem:[#allocation8 + $0xb0] sm:$0xff]  ;;  %v1118_v62 = vsel %vm954_vm10, %v1117_v4, %v2069_v22  ;;  %v1265_v22 = vld [vmem:[#allocation8 + $0x98] sm:$0xff] }
 0x1ba   :  { %v1194_v25 = vsel %vm1193_vm1, %v1064_v56, %v1192_v5  ;;  %v1309_v5 = vld [vmem:[#allocation8 + $0x1f8] sm:$0xff]  ;;  %1320 = vmatpush.msra.mxu2 %v1268_v24 }
 0x1bb   :  { %1376 = vmatpush.msrb.mxu1 %v1309_v5  ;;  %v1269_v56 = vld [vmem:[#allocation8 + $0xb8] sm:$0xff]  ;;  %v1148_v5 = vperm.slane %v2098_v45, %v1960_v7  ;;  %v1147_v45 = vsel %vm950_vm9, %v1146_v41, %v2063_v52 }
 0x1bc   :  { %1360 = vmatpush.msrb.mxu0 %v1269_v56  ;;  %1321 = vmatpush.msra.mxu2 %v1266_v57  ;;  %v1257_v52 = vld [vmem:[#allocation8 + $0x58] sm:$0xff]  ;;  %v1177_v56 = vperm.slane %v2096_v26, %v1921_v6  ;;  %v1287_v57 = vld [vmem:[#allocation8 + $0x148] sm:$0xff] }
 0x1bd   :  { %v2105_v37 = vpop.xlane.xlu1 %639  ;;  %1377 = vmatpush.msrb.mxu1 %v1307_v29  ;;  %v1258_v29 = vld [vmem:[#allocation8 + $0x60] sm:$0xff]  ;;  %v1253_v26 = vld [vmem:[#allocation8 + $0x38] sm:$0xff] }
 0x1be   :  { %v2107_v19 = vpop.xlane.xlu2 %684  ;;  %v1121_v51 = vperm.slane %v2105_v37, %v2018_v49  ;;  %v1120_v37 = vsel %vm958_vm11, %v1119_v18, %v1118_v62  ;;  %1361 = vmatpush.msrb.mxu0 %v1267_v42  ;;  %1322 = vmatpush.msra.mxu2 %v1264_v33  ;;  %v1175_v18 = vperm.slane %v2083_v0, %v1894_v28  ;;  %v1252_v0 = vld [vmem:[#allocation8 + $0x30] sm:$0xff]  ;;  %v1281_v41 = vld [vmem:[#allocation8 + $0x118] sm:$0xff] }
 0x1bf   :  { %v595_v44 = vpop.xlane.xlu0 %594  ;;  %1378 = vmatpush.msrb.mxu1 %v1305_v15  ;;  %v1284_v62 = vld [vmem:[#allocation8 + $0x130] sm:$0xff] }
 0x1c0   :  { %v1092_v13 = vperm.slane %v595_v44, %v2041_v60  ;;  %v1299_v44 = vld [vmem:[#allocation8 + $0x1a8] sm:$0xff]  ;;  %v1122_v55 = vsel %vm962_vm12, %v1121_v51, %v1120_v37  ;;  %1362 = vmatpush.msrb.mxu0 %v1265_v22  ;;  %v1286_v51 = vld [vmem:[#allocation8 + $0x140] sm:$0xff]  ;;  %v1176_v37 = vsel %vm946_vm8, %v1175_v18, %v2066_v53 }
 0x1c1   :  { %1379 = vmatpush.msrb.mxu1 %v1303_v38  ;;  %v1289_v38 = vld [vmem:[#allocation8 + $0x158] sm:$0xff]  ;;  %v1250_v22 = vld [vmem:[#allocation8 + $0x20] sm:$0xff] }
 0x1c2   :  { %v1093_v27 = vsel %vm966_vm13, %v1092_v13, %v1091_v43  ;;  %v1262_v13 = vld [vmem:[#allocation8 + $0x80] sm:$0xff]  ;;  %v1292_v43 = vld [vmem:[#allocation8 + $0x170] sm:$0xff]  ;;  %1363 = vmatpush.msrb.mxu0 %v1263_v61 }
 0x1c3   :  { %1380 = vmatpush.msrb.mxu1 %v1301_v58  ;;  %1323 = vmatpush.msra.mxu2 %v1262_v13  ;;  %v1248_v13 = vld [vmem:[#allocation8 + $0x10] sm:$0xff]  ;;  %v1278_v61 = vld [vmem:[#allocation8 + $0x100] sm:$0xff] }
 0x1c4   :  { %1364 = vmatpush.msrb.mxu0 %v1261_v10  ;;  %v1427_v10 = vld [vmem:[#allocation10 + $0xe8] sm:$0xff] }
 0x1c5   :  { %v598_v1 = vpop.xlane.xlu1 %597  ;;  %1381 = vmatpush.msrb.mxu1 %v1299_v44  ;;  %1324 = vmatpush.msra.mxu2 %v1260_v14  ;;  %v1285_v44 = vld [vmem:[#allocation8 + $0x138] sm:$0xff]  ;;  %v1428_v14 = vld [vmem:[#allocation10 + $0xf0] sm:$0xff] }
 0x1c6   :  { %v1094_v16 = vperm.slane %v598_v1, %v2072_v54  ;;  %v643_v2 = vpop.xlane.xlu2 %642  ;;  %v1295_v1 = vld [vmem:[#allocation8 + $0x188] sm:$0xff]  ;;  %1365 = vmatpush.msrb.mxu0 %v1259_v32  ;;  %v1408_v32 = vld [vmem:[#allocation10 + $0x50] sm:$0xff] }
 0x1c7   :  { %v2118_v17 = vpop.xlane.xlu0 %729  ;;  %v1123_v39 = vperm.slane %v643_v2, %v2041_v60  ;;  %1382 = vmatpush.msrb.mxu1 %v1297_v12  ;;  %v1293_v2 = vld [vmem:[#allocation8 + $0x178] sm:$0xff]  ;;  %1325 = vmatpush.msra.mxu2 %v1258_v29  ;;  %v1282_v12 = vld [vmem:[#allocation8 + $0x120] sm:$0xff] }
 0x1c8   :  { %v1095_v35 = vsel %vm970_vm14, %v1094_v16, %v1093_v27  ;;  %v1150_v16 = vperm.slane %v2107_v19, %v1999_v8  ;;  %v1149_v19 = vsel %vm954_vm10, %v1148_v5, %v1147_v45  ;;  %1366 = vmatpush.msrb.mxu0 %v1257_v52  ;;  %v1279_v5 = vld [vmem:[#allocation8 + $0x108] sm:$0xff]  ;;  %v1410_v29 = vld [vmem:[#allocation10 + $0x60] sm:$0xff]  ;;  %v1409_v45 = vld [vmem:[#allocation10 + $0x58] sm:$0xff] }
 0x1c9   :  { %v1196_v9 = vsel %vm1195_vm2, %v1095_v35, %v1194_v25  ;;  %v1298_v25 = vld [vmem:[#allocation8 + $0x1a0] sm:$0xff]  ;;  %v1124_v47 = vsel %vm966_vm13, %v1123_v39, %v1122_v55  ;;  %1383 = vmatpush.msrb.mxu1 %v1295_v1  ;;  %1326 = vmatpush.msra.mxu2 %v1256_v23  ;;  %v1255_v39 = vld [vmem:[#allocation8 + $0x48] sm:$0xff]  ;;  %v1421_v23 = vld [vmem:[#allocation10 + $0xb8] sm:$0xff] }
 0x1ca   :  { %1341 = vmatpush.msra.mxu3 %v1298_v25  ;;  %v1151_v4 = vsel %vm958_vm11, %v1150_v16, %v1149_v19  ;;  %v1179_v25 = vperm.slane %v2118_v17, %v1960_v7  ;;  %1367 = vmatpush.msrb.mxu0 %v1255_v39  ;;  %v1178_v17 = vsel %vm950_vm9, %v1177_v56, %v1176_v37  ;;  %v1247_v1 = vld [vmem:[#allocation8 + $0x8] sm:$0xff]  ;;  %v1412_v16 = vld [vmem:[#allocation10 + $0x70] sm:$0xff]  ;;  %v1418_v52 = vld [vmem:[#allocation10 + $0xa0] sm:$0xff] }
 0x1cb   :  { %1384 = vmatpush.msrb.mxu1 %v1293_v2  ;;  %1327 = vmatpush.msra.mxu2 %v1254_v48  ;;  %v1411_v2 = vld [vmem:[#allocation10 + $0x68] sm:$0xff] }
 0x1cc   :  { %1342 = vmatpush.msra.mxu3 %v1296_v59  ;;  %1368 = vmatpush.msrb.mxu0 %v1253_v26  ;;  %v1407_v19 = vld [vmem:[#allocation10 + $0x48] sm:$0xff]  ;;  %v1414_v26 = vld [vmem:[#allocation10 + $0x80] sm:$0xff] }
 0x1cd   :  { %v2132_v40 = vpop.xlane.xlu1 %732  ;;  %1385 = vmatpush.msrb.mxu1 %v1291_v34  ;;  %1328 = vmatpush.msra.mxu2 %v1252_v0  ;;  %v1423_v34 = vld [vmem:[#allocation10 + $0xc8] sm:$0xff]  ;;  %v1416_v0 = vld [vmem:[#allocation10 + $0x90] sm:$0xff] }
 0x1ce   :  { %v646_v20 = vpop.xlane.xlu2 %645  ;;  %1343 = vmatpush.msra.mxu3 %v1294_v63  ;;  %v1181_v42 = vperm.slane %v2132_v40, %v1999_v8  ;;  %v1180_v8 = vsel %vm954_vm10, %v1179_v25, %v1178_v17  ;;  %v1249_v63 = vld [vmem:[#allocation8 + $0x18] sm:$0xff]  ;;  %v1399_v37 = vld [vmem:[#allocation10 + $0x8] sm:$0xff] }
 0x1cf   :  { %v688_v31 = vpop.xlane.xlu0 %687  ;;  %v1125_v11 = vperm.slane %v646_v20, %v2072_v54  ;;  %1386 = vmatpush.msrb.mxu1 %v1289_v38  ;;  %1329 = vmatpush.msra.mxu2 %v1250_v22  ;;  %v1417_v25 = vld [vmem:[#allocation10 + $0x98] sm:$0xff] }
 0x1d0   :  { %v1152_v21 = vperm.slane %v688_v31, %v2018_v49  ;;  %1344 = vmatpush.msra.mxu3 %v1292_v43  ;;  %v1182_v33 = vsel %vm958_vm11, %v1181_v42, %v1180_v8  ;;  %v1413_v43 = vld [vmem:[#allocation10 + $0x78] sm:$0xff]  ;;  %v1415_v42 = vld [vmem:[#allocation10 + $0x88] sm:$0xff] }
 0x1d1   :  { %v1126_v50 = vsel %vm970_vm14, %v1125_v11, %v1124_v47  ;;  %1387 = vmatpush.msrb.mxu1 %v1287_v57  ;;  %v1251_v47 = vld [vmem:[#allocation8 + $0x28] sm:$0xff]  ;;  %1330 = vmatpush.msra.mxu2 %v1248_v13  ;;  %v1404_v57 = vld [vmem:[#allocation10 + $0x30] sm:$0xff]  ;;  %v1310_v17 = vld [vmem:[%s2189_s4] sm:$0x3]  ;;  %s1666_s4 = smov [#allocation11]  }
 0x1d2   :  { %v1198_v46 = vsel %vm1197_vm3, %v1126_v50, %v1196_v9  ;;  %1345 = vmatpush.msra.mxu3 %v1290_v30  ;;  %v1153_v24 = vsel %vm962_vm12, %v1152_v21, %v1151_v4  ;;  %1369 = vmatpush.msrb.mxu0 %v1251_v47  ;;  %v1246_v50 = vld [vmem:[#allocation8] sm:$0xff]  ;;  %v1425_v30 = vld [vmem:[#allocation10 + $0xd8] sm:$0xff]  ;;  %v1420_v4 = vld [vmem:[#allocation10 + $0xb0] sm:$0xff]  ;;  %s1480_s29 = sshll.u32 %s1666_s4, 4  ;;  %s1481_s29 = int_to_ptr.vmem [resolvable:$true] %s1480_s29 }
 0x1d3   :  { %1388 = vmatpush.msrb.mxu1 %v1285_v44  ;;  %1331 = vmatpush.msra.mxu2 %v1246_v50  ;;  %v1426_v21 = vld [vmem:[#allocation10 + $0xe0] sm:$0xff]  ;;  %v1400_v44 = vld [vmem:[#allocation10 + $0x10] sm:$0xff]  ;;  %v1504_v47 = vld [vmem:[%s2191_s6] ss:$0 sm:$0xff] }
 0x1d4   :  { %1346 = vmatpush.msra.mxu3 %v1288_v36  ;;  %1370 = vmatpush.msrb.mxu0 %v1249_v63  ;;  %v1405_v36 = vld [vmem:[#allocation10 + $0x38] sm:$0xff] }
 0x1d5   :  { %v736_v27 = vpop.xlane.xlu1 %735  ;;  %1434 = vmatpush.msrb.mxu2 %v1413_v43 }
 0x1d6   :  { %v694_v35 = vpop.xlane.xlu2 %693  ;;  %1347 = vmatpush.msra.mxu3 %v1286_v51  ;;  %v1183_v7 = vperm.slane %v736_v27, %v2018_v49  ;;  %1371 = vmatpush.msrb.mxu0 %v1247_v1  ;;  %v1424_v27 = vld [vmem:[#allocation10 + $0xd0] sm:$0xff] }
 0x1d7   :  { %v691_v15 = vpop.xlane.xlu0 %690  ;;  %v1156_v3 = vperm.slane %v694_v35, %v2072_v54  ;;  %1435 = vmatpush.msrb.mxu2 %v1412_v16  ;;  %v1406_v35 = vld [vmem:[#allocation10 + $0x40] sm:$0xff] }
 0x1d8   :  { %v1154_v9 = vperm.slane %v691_v15, %v2041_v60  ;;  %1348 = vmatpush.msra.mxu3 %v1284_v62  ;;  %v1184_v49 = vsel %vm962_vm12, %v1183_v7, %v1182_v33  ;;  %v1422_v15 = vld [vmem:[#allocation10 + $0xc0] sm:$0xff]  ;;  %v1312_v33 = vperm.slane %v1310_v17, 0 }
 0x1d9   :  { %1436 = vmatpush.msrb.mxu2 %v1411_v2  ;;  %v1402_v62 = vld [vmem:[#allocation10 + $0x20] sm:$0xff] }
 0x1da   :  { %v1155_v58 = vsel %vm966_vm13, %v1154_v9, %v1153_v24  ;;  %1349 = vmatpush.msra.mxu3 %v1282_v12  ;;  %v1419_v9 = vld [vmem:[#allocation10 + $0xa8] sm:$0xff]  ;;  %v1398_v7 = vld [vmem:[#allocation10] sm:$0xff] }
 0x1db   :  { %v1157_v28 = vsel %vm970_vm14, %v1156_v3, %v1155_v58  ;;  %1437 = vmatpush.msrb.mxu2 %v1410_v29  ;;  %v775_v3 = vld [vmem:[#allocation7] sm:$0x3] }
 0x1dc   :  { %v1200_v6 = vsel %vm1199_vm4, %v1157_v28, %v1198_v46  ;;  %v1429_v46 = vld [vmem:[#allocation10 + $0xf8] sm:$0xff]  ;;  %v777_v38 = vperm.slane %v775_v3, 0  ;;  %v778_v18 = vperm.slane %v775_v3, 1  ;;  %v1403_v28 = vld [vmem:[#allocation10 + $0x28] sm:$0xff] }
 0x1dd   :  { %v742_v20 = vpop.xlane.xlu1 %741  ;;  %1438 = vmatpush.msrb.mxu2 %v1409_v45 }
 0x1de   :  { %v1187_v31 = vperm.slane %v742_v20, %v2072_v54  ;;  %v1283_v54 = vld [vmem:[#allocation8 + $0x128] sm:$0xff]  ;;  %v1313_v20 = vperm.slane %v1310_v17, 1 }
 0x1df   :  { %v739_v40 = vpop.xlane.xlu0 %738  ;;  %1389 = vmatpush.msrb.mxu1 %v1283_v54  ;;  %1439 = vmatpush.msrb.mxu2 %v1408_v32 }
 0x1e0   :  { %v1185_v53 = vperm.slane %v739_v40, %v2041_v60  ;;  %v1280_v60 = vld [vmem:[#allocation8 + $0x110] sm:$0xff] }
 0x1e1   :  { %1350 = vmatpush.msra.mxu3 %v1280_v60  ;;  %1390 = vmatpush.msrb.mxu1 %v1281_v41 }
 0x1e2   :  { %v1186_v59 = vsel %vm966_vm13, %v1185_v53, %v1184_v49  ;;  %1440 = vmatpush.msrb.mxu2 %v1407_v19 }
 0x1e3   :  { %v1188_v55 = vsel %vm970_vm14, %v1187_v31, %v1186_v59  ;;  %1351 = vmatpush.msra.mxu3 %v1278_v61  ;;  %1391 = vmatpush.msrb.mxu1 %v1279_v5 }
 0x1e4   :  { %v1202_v11 = vsel %vm1201_vm5, %v1188_v55, %v1200_v6  ;;  %1441 = vmatpush.msrb.mxu2 %v1406_v35  ;;  %v1401_v6 = vld [vmem:[#allocation10 + $0x18] sm:$0xff] }
 0x1e5   :  { %1220 = vmatmul.f32.vlgmr.msra.gmra.mxu0 %v1202_v11  ;;  %1240 = vmatmul.f32.vlgmr.msra.gmra.mxu1 %v1202_v11 }
 0x1e6   :  { %1454 = vmatpush.msrb.mxu3 %v1429_v46  ;;  %1442 = vmatpush.msrb.mxu2 %v1405_v36 }
 0x1e8   :  { %1455 = vmatpush.msrb.mxu3 %v1428_v14  ;;  %1443 = vmatpush.msrb.mxu2 %v1404_v57 }
 0x1ea   :  { %1456 = vmatpush.msrb.mxu3 %v1427_v10  ;;  %1444 = vmatpush.msrb.mxu2 %v1403_v28 }
 0x1ec   :  { %1457 = vmatpush.msrb.mxu3 %v1426_v21  ;;  %1445 = vmatpush.msrb.mxu2 %v1402_v62 }
 0x1ee   :  { %1458 = vmatpush.msrb.mxu3 %v1425_v30  ;;  %1446 = vmatpush.msrb.mxu2 %v1401_v6 }
 0x1f0   :  { %1459 = vmatpush.msrb.mxu3 %v1424_v27  ;;  %1447 = vmatpush.msrb.mxu2 %v1400_v44 }
 0x1f2   :  { %1460 = vmatpush.msrb.mxu3 %v1423_v34  ;;  %1448 = vmatpush.msrb.mxu2 %v1399_v37 }
 0x1f4   :  { %1461 = vmatpush.msrb.mxu3 %v1422_v15  ;;  %1449 = vmatpush.msrb.mxu2 %v1398_v7 }
 0x1f6   :  { %1462 = vmatpush.msrb.mxu3 %v1421_v23 }
 0x1f8   :  { %1463 = vmatpush.msrb.mxu3 %v1420_v4 }
 0x1fa   :  { %1464 = vmatpush.msrb.mxu3 %v1419_v9 }
 0x1fc   :  { %1465 = vmatpush.msrb.mxu3 %v1418_v52 }
 0x1fe   :  { %1466 = vmatpush.msrb.mxu3 %v1417_v25 }
 0x200   :  { %1467 = vmatpush.msrb.mxu3 %v1416_v0 }
 0x202   :  { %1468 = vmatpush.msrb.mxu3 %v1415_v42 }
 0x204   :  { %1469 = vmatpush.msrb.mxu3 %v1414_v26 }
 0x262   :  { %v1221_v24 = vpop.f32.mrf.mxu0  ;;  %v1241_v48 = vpop.f32.mrf.mxu1 }
 0x263   :  { %v1222_v51 = vadd.f32 %v1221_v24, %v777_v38  ;;  %v1242_v56 = vadd.f32 %v1241_v48, %v778_v18 }
 0x265   :  { %v1244_v58 = vmax.f32 %v1222_v51, 0.0  ;;  %v1245_v39 = vmax.f32 %v1242_v56, 0.0 }
 0x267   :  { %1332 = vmatmul.f32.vlgmr.msra.gmra.mxu2 %v1244_v58  ;;  %1352 = vmatmul.f32.vlgmr.msra.gmra.mxu3 %v1245_v39 }
 0x268   :  { %1372 = vmatmul.f32.vlgmr.msrb.gmra.mxu0 %v1244_v58  ;;  %1392 = vmatmul.f32.vlgmr.msrb.gmra.mxu1 %v1245_v39 }
 0x2e5   :  { %v1373_v8 = vpop.f32.mrf.mxu0  ;;  %v1393_v31 = vpop.f32.mrf.mxu1 }
 0x2e6   :  { %v1374_v40 = vadd.f32 %v1373_v8, %v1313_v20 }
 0x2e8   :  { %v1394_v53 = vadd.f32 %v1393_v31, %v1374_v40 }
 0x2ea   :  { %v1397_v49 = vmax.f32 %v1394_v53, 0.0  ;;  %v1333_v59 = vpop.f32.mrf.mxu2  ;;  %v1353_v11 = vpop.f32.mrf.mxu3 }
 0x2eb   :  { %v1334_v55 = vadd.f32 %v1333_v59, %v1312_v33 }
 0x2ec   :  { %1470 = vmatmul.f32.vlgmr.msrb.gmra.mxu3 %v1397_v49 }
 0x2ed   :  { %v1354_v22 = vadd.f32 %v1353_v11, %v1334_v55 }
 0x2ef   :  { %v1396_v12 = vmax.f32 %v1354_v22, 0.0 }
 0x2f1   :  { %1450 = vmatmul.f32.vlgmr.msrb.gmra.mxu2 %v1396_v12 }
 0x36f   :  { %v1471_v60 = vpop.f32.mrf.mxu3 }
 0x374   :  { %v1451_v54 = vpop.f32.mrf.mxu2 }
 0x375   :  { %v1452_v13 = vadd.f32 %v1504_v47, %v1451_v54 }
 0x377   :  { %v1472_v63 = vadd.f32 %v1471_v60, %v1452_v13 }
 0x379   :  { %1474 = vst [vmem:[#allocation11] sm:$0xff] %v1472_v63 }
 0x37a   :  { %1485 = dma.vmem_to_hbm [thread:$0]  %s1481_s29, 128, %s1483_s9, [#allocation4]  }
 0x37b   :  { %1655 = dma.done.wait [#allocation4], 128  }
 0x37c   :  { %1656 = vsyncadd [#allocation4], 4294967168 }
 0x37d   :  { %1490 = vsyncpa [#allocation3], 1 }
 0x37e   :  { %1491 = vsyncpa [#allocation6], 1 }
 0x37f   :  { %1492 = vsyncpa [#allocation9], 1 }
 0x380   :  { %1493 = vsyncpa [#allocation4], 1 }

</bundles_post_ra>
